<compile_context>
chip_gen: v6e
topology: v6e:2x2x1
jax: 0.10.0
libtpu: 0.0.40
codegen_flags: <defaults>
</compile_context>

<pallas_src>
import functools
import numpy as np

import jax
import jax.numpy as jnp
from jax.experimental import pallas as pl
from jax.experimental.pallas import tpu as pltpu


_VMEM_LIMIT = 32 * 1024 * 1024  # explicit scoped-VMEM budget (safe on v5e/v6e/v7x)


def _cparams(*sems):
    return pltpu.CompilerParams(dimension_semantics=tuple(sems),
                                vmem_limit_bytes=_VMEM_LIMIT)


def _pick(dim, cap):
    return dim if dim <= cap else cap


def _pad2d(a, rows, cols):
    r, c = a.shape
    if r == rows and c == cols:
        return a
    return jnp.pad(a, ((0, rows - r), (0, cols - c)))


# ----------------------------------------------------------------------------
# Tiled matmul (+ bias, optional GELU, optional fused residual add)
# ----------------------------------------------------------------------------

def _linear_kernel(*refs, activation, has_residual):
    if has_residual:
        x_ref, w_ref, b_ref, r_ref, o_ref, acc_ref = refs
    else:
        x_ref, w_ref, b_ref, o_ref, acc_ref = refs
        r_ref = None

    @pl.when(pl.program_id(2) == 0)
    def _init():
        acc_ref[...] = jnp.zeros_like(acc_ref)

    acc_ref[...] += jnp.dot(x_ref[...], w_ref[...],
                            preferred_element_type=jnp.float32)

    @pl.when(pl.program_id(2) == pl.num_programs(2) - 1)
    def _finalize():
        acc = acc_ref[...] + b_ref[...]
        if activation == "gelu":
            # TODO(synk): HF ViT uses exact (erf) GELU; tanh approximation used here.
            acc = jax.nn.gelu(acc, approximate=True)
        if r_ref is not None:
            acc = acc + r_ref[...].astype(jnp.float32)
        o_ref[...] = acc.astype(o_ref.dtype)


def linear(x, w, b, *, activation=None, residual=None,
           tm=256, tn=512, tk=512, out_dtype=jnp.bfloat16):
    """y = x @ w + b [(+GELU)] [(+residual)], tiled with f32 VMEM accumulator."""
    M, K = x.shape
    K2, N = w.shape
    assert K == K2
    tm, tn, tk = _pick(M, tm), _pick(N, tn), _pick(K, tk)
    gm, gn, gk = pl.cdiv(M, tm), pl.cdiv(N, tn), pl.cdiv(K, tk)
    Mp, Np, Kp = gm * tm, gn * tn, gk * tk

    args = [_pad2d(x.astype(jnp.bfloat16), Mp, Kp),
            _pad2d(w.astype(jnp.bfloat16), Kp, Np),
            _pad2d(b.reshape(1, N).astype(jnp.float32), 1, Np)]
    in_specs = [pl.BlockSpec((tm, tk), lambda i, j, k: (i, k)),
                pl.BlockSpec((tk, tn), lambda i, j, k: (k, j)),
                pl.BlockSpec((1, tn), lambda i, j, k: (0, j))]
    if residual is not None:
        args.append(_pad2d(residual.astype(jnp.bfloat16), Mp, Np))
        in_specs.append(pl.BlockSpec((tm, tn), lambda i, j, k: (i, j)))

    out = pl.pallas_call(
        functools.partial(_linear_kernel, activation=activation,
                          has_residual=residual is not None),
        out_shape=jax.ShapeDtypeStruct((Mp, Np), out_dtype),
        grid=(gm, gn, gk),
        in_specs=in_specs,
        out_specs=pl.BlockSpec((tm, tn), lambda i, j, k: (i, j)),
        scratch_shapes=[pltpu.VMEM((tm, tn), jnp.float32)],
        compiler_params=_cparams("parallel", "parallel", "arbitrary"),
    )(*args)
    return out[:M, :N] if (Mp, Np) != (M, N) else out


# ----------------------------------------------------------------------------
# LayerNorm fused into the following matmul (full K resident per block)
# ----------------------------------------------------------------------------

def _ln_linear_kernel(x_ref, g_ref, bln_ref, w_ref, b_ref, o_ref, *, eps, activation):
    x = x_ref[...].astype(jnp.float32)
    mu = jnp.mean(x, axis=-1, keepdims=True)
    var = jnp.mean(jnp.square(x - mu), axis=-1, keepdims=True)
    xn = (x - mu) * jax.lax.rsqrt(var + eps) * g_ref[...] + bln_ref[...]
    acc = jnp.dot(xn.astype(w_ref.dtype), w_ref[...],
                  preferred_element_type=jnp.float32) + b_ref[...]
    if activation == "gelu":
        acc = jax.nn.gelu(acc, approximate=True)
    o_ref[...] = acc.astype(o_ref.dtype)


def ln_linear(x, gamma, beta, w, b, *, eps=1e-12, activation=None,
              tm=256, tn=512, out_dtype=jnp.bfloat16):
    M, K = x.shape
    _, N = w.shape
    tm, tn = _pick(M, tm), _pick(N, tn)
    gm, gn = pl.cdiv(M, tm), pl.cdiv(N, tn)
    Mp, Np = gm * tm, gn * tn
    out = pl.pallas_call(
        functools.partial(_ln_linear_kernel, eps=eps, activation=activation),
        out_shape=jax.ShapeDtypeStruct((Mp, Np), out_dtype),
        grid=(gm, gn),
        in_specs=[pl.BlockSpec((tm, K), lambda i, j: (i, 0)),
                  pl.BlockSpec((1, K), lambda i, j: (0, 0)),
                  pl.BlockSpec((1, K), lambda i, j: (0, 0)),
                  pl.BlockSpec((K, tn), lambda i, j: (0, j)),
                  pl.BlockSpec((1, tn), lambda i, j: (0, j))],
        out_specs=pl.BlockSpec((tm, tn), lambda i, j: (i, j)),
        compiler_params=_cparams("parallel", "parallel"),
    )(_pad2d(x.astype(jnp.bfloat16), Mp, K),
      gamma.reshape(1, K).astype(jnp.float32),
      beta.reshape(1, K).astype(jnp.float32),
      _pad2d(w.astype(jnp.bfloat16), K, Np),
      _pad2d(b.reshape(1, N).astype(jnp.float32), 1, Np))
    return out[:M, :N] if (Mp, Np) != (M, N) else out


# ----------------------------------------------------------------------------
# Fused MLP block: LN2 + fc1 + GELU + fc2 + residual  (one kernel, one HBM pass)
# ----------------------------------------------------------------------------

def _mlp_kernel(x_ref, g_ref, bln_ref, w1_ref, b1_ref, w2_ref, b2_ref, o_ref, *, eps):
    x = x_ref[...].astype(jnp.float32)            # (tm, H); also the residual branch
    mu = jnp.mean(x, axis=-1, keepdims=True)
    var = jnp.mean(jnp.square(x - mu), axis=-1, keepdims=True)
    xn = (x - mu) * jax.lax.rsqrt(var + eps) * g_ref[...] + bln_ref[...]
    h = jnp.dot(xn.astype(w1_ref.dtype), w1_ref[...],
                preferred_element_type=jnp.float32) + b1_ref[...]
    # TODO(synk): HF ViT uses exact (erf) GELU; tanh approximation used here.
    h = jax.nn.gelu(h, approximate=True)
    y = jnp.dot(h.astype(w2_ref.dtype), w2_ref[...],
                preferred_element_type=jnp.float32) + b2_ref[...]
    o_ref[...] = (x + y).astype(o_ref.dtype)


def mlp_block(x, gamma, beta, w1, b1, w2, b2, *, eps=1e-12, tm=256,
              out_dtype=jnp.bfloat16):
    M, H = x.shape
    I = w1.shape[1]
    tm = _pick(M, tm)
    gm = pl.cdiv(M, tm)
    Mp = gm * tm
    out = pl.pallas_call(
        functools.partial(_mlp_kernel, eps=eps),
        out_shape=jax.ShapeDtypeStruct((Mp, H), out_dtype),
        grid=(gm,),
        in_specs=[pl.BlockSpec((tm, H), lambda i: (i, 0)),
                  pl.BlockSpec((1, H), lambda i: (0, 0)),
                  pl.BlockSpec((1, H), lambda i: (0, 0)),
                  pl.BlockSpec((H, I), lambda i: (0, 0)),
                  pl.BlockSpec((1, I), lambda i: (0, 0)),
                  pl.BlockSpec((I, H), lambda i: (0, 0)),
                  pl.BlockSpec((1, H), lambda i: (0, 0))],
        out_specs=pl.BlockSpec((tm, H), lambda i: (i, 0)),
        compiler_params=_cparams("parallel"),
    )(_pad2d(x.astype(jnp.bfloat16), Mp, H),
      gamma.reshape(1, H).astype(jnp.float32),
      beta.reshape(1, H).astype(jnp.float32),
      w1.astype(jnp.bfloat16), b1.reshape(1, I).astype(jnp.float32),
      w2.astype(jnp.bfloat16), b2.reshape(1, H).astype(jnp.float32))
    return out[:M] if Mp != M else out


# ----------------------------------------------------------------------------
# Standalone LayerNorm (row-tiled) — used for the final ViTModel layernorm
# ----------------------------------------------------------------------------

def _layernorm_kernel(x_ref, g_ref, b_ref, o_ref, *, eps):
    x = x_ref[...].astype(jnp.float32)
    mu = jnp.mean(x, axis=-1, keepdims=True)
    var = jnp.mean(jnp.square(x - mu), axis=-1, keepdims=True)
    o_ref[...] = ((x - mu) * jax.lax.rsqrt(var + eps) * g_ref[...]
                  + b_ref[...]).astype(o_ref.dtype)


def layernorm(x, gamma, beta, *, eps=1e-12, tm=512, out_dtype=jnp.bfloat16):
    M, H = x.shape
    tm = _pick(M, tm)
    gm = pl.cdiv(M, tm)
    Mp = gm * tm
    out = pl.pallas_call(
        functools.partial(_layernorm_kernel, eps=eps),
        out_shape=jax.ShapeDtypeStruct((Mp, H), out_dtype),
        grid=(gm,),
        in_specs=[pl.BlockSpec((tm, H), lambda i: (i, 0)),
                  pl.BlockSpec((1, H), lambda i: (0, 0)),
                  pl.BlockSpec((1, H), lambda i: (0, 0))],
        out_specs=pl.BlockSpec((tm, H), lambda i: (i, 0)),
        compiler_params=_cparams("parallel"),
    )(_pad2d(x.astype(jnp.bfloat16), Mp, H),
      gamma.reshape(1, H).astype(jnp.float32),
      beta.reshape(1, H).astype(jnp.float32))
    return out[:M] if Mp != M else out


# ----------------------------------------------------------------------------
# Attention: all heads of one batch element per grid step (lane-denser, fewer steps)
# ----------------------------------------------------------------------------

def _attn_kernel(q_ref, k_ref, v_ref, o_ref, *, scale):
    q = q_ref[0]          # (nh, S, Dh) bf16
    k = k_ref[0]
    v = v_ref[0]
    s = jnp.einsum("hqd,hkd->hqk", q, k,
                   preferred_element_type=jnp.float32) * scale
    m = jnp.max(s, axis=-1, keepdims=True)
    p = jnp.exp(s - m)
    p = p * pl.reciprocal(jnp.sum(p, axis=-1, keepdims=True), approx=True)
    ctx = jnp.einsum("hqk,hkd->hqd", p.astype(v.dtype), v,
                     preferred_element_type=jnp.float32)
    o_ref[0] = ctx.astype(o_ref.dtype)


def attention(q, k, v):
    """q, k, v: (B, num_heads, S, Dh). Fused softmax(QK^T/sqrt(Dh))V, all heads per step."""
    # TODO(synk): for long sequences this should be tiled flash-style over KV blocks.
    B, nh, S, Dh = q.shape
    scale = 1.0 / float(np.sqrt(Dh))
    spec = pl.BlockSpec((1, nh, S, Dh), lambda b: (b, 0, 0, 0))
    return pl.pallas_call(
        functools.partial(_attn_kernel, scale=scale),
        out_shape=jax.ShapeDtypeStruct((B, nh, S, Dh), jnp.bfloat16),
        grid=(B,),
        in_specs=[spec, spec, spec],
        out_specs=spec,
        compiler_params=_cparams("parallel"),
    )(q, k, v)


# ----------------------------------------------------------------------------
# Fused separable bilinear upsample (align_corners=False), NCHW in -> NCHW out
# ----------------------------------------------------------------------------

def _bilinear_matrix(out_size, in_size):
    """Interpolation matrix for 1-D bilinear resize, align_corners=False (PyTorch)."""
    A = np.zeros((out_size, in_size), dtype=np.float32)
    if in_size == 1:
        A[:, 0] = 1.0
        return jnp.asarray(A)
    scale = in_size / out_size
    for i in range(out_size):
        src = max((i + 0.5) * scale - 0.5, 0.0)
        i0 = min(int(np.floor(src)), in_size - 1)
        i1 = min(i0 + 1, in_size - 1)
        w1 = src - i0
        A[i, i0] += 1.0 - w1
        A[i, i1] += w1
    return jnp.asarray(A)


def _upsample_kernel(x_ref, awt_ref, ah_ref, o_ref, *, ct):
    x = x_ref[0].astype(jnp.float32)                     # (ct, Hin, Win)
    hin, win = x.shape[1], x.shape[2]
    # width pass: one lane-dense matmul over the whole channel tile
    t = jnp.dot(x.reshape(ct * hin, win), awt_ref[...],
                preferred_element_type=jnp.float32)      # (ct*Hin, Wout)
    t = t.reshape(ct, hin, -1)
    ah = ah_ref[...]                                     # (Hout, Hin)
    # height pass: small per-channel matmuls, stores go straight to NCHW tiles
    for c in range(ct):
        o_ref[0, c] = jnp.dot(ah, t[c], preferred_element_type=jnp.float32)


def bilinear_upsample(feat, out_hw):
    """feat: (B, C, Hin, Win) -> (B, C, Hout, Wout); out = A_h @ feat @ A_w^T per channel."""
    B, C, Hin, Win = feat.shape
    Hout, Wout = out_hw
    ah = _bilinear_matrix(Hout, Hin)         # (Hout, Hin)
    awt = _bilinear_matrix(Wout, Win).T      # (Win, Wout)
    ct = next(d for d in (8, 4, 2, 1) if C % d == 0)
    return pl.pallas_call(
        functools.partial(_upsample_kernel, ct=ct),
        out_shape=jax.ShapeDtypeStruct((B, C, Hout, Wout), jnp.float32),
        grid=(B, C // ct),
        in_specs=[pl.BlockSpec((1, ct, Hin, Win), lambda b, c: (b, c, 0, 0)),
                  pl.BlockSpec((Win, Wout), lambda b, c: (0, 0)),
                  pl.BlockSpec((Hout, Hin), lambda b, c: (0, 0))],
        out_specs=pl.BlockSpec((1, ct, Hout, Wout), lambda b, c: (b, c, 0, 0)),
        compiler_params=_cparams("parallel", "parallel"),
    )(feat, awt, ah)


# ----------------------------------------------------------------------------
# Model glue
# ----------------------------------------------------------------------------

def vit_layer(x, p, num_heads):
    B, S, H = x.shape
    Dh = H // num_heads
    x2 = x.reshape(B * S, H)

    # LN1 fused into one QKV projection (wq|wk|wv concatenated along the output dim).
    qkv = ln_linear(x2, p["ln1_g"], p["ln1_b"], p["w_qkv"], p["b_qkv"])     # (B*S, 3H)
    qkv = qkv.reshape(B, S, 3, num_heads, Dh).transpose(2, 0, 3, 1, 4)      # (3,B,nh,S,Dh)
    ctx = attention(qkv[0], qkv[1], qkv[2])                                 # (B,nh,S,Dh)
    ctx = ctx.transpose(0, 2, 1, 3).reshape(B * S, H)

    # attention output projection with the first residual fused in
    h = linear(ctx, p["wo"], p["bo"], residual=x2)                          # (B*S, H)

    # LN2 + fc1 + GELU + fc2 + second residual, single kernel
    out = mlp_block(h, p["ln2_g"], p["ln2_b"],
                    p["w_fc1"], p["b_fc1"], p["w_fc2"], p["b_fc2"])
    return out.reshape(B, S, H)


def vit_backbone_forward(spatial_features, params, cfg):
    B, C, H, W = spatial_features.shape
    assert C == cfg["input_channels"]
    P = cfg["patch_size"]
    hidden = cfg["hidden"]
    Hp, Wp = H // P, W // P
    Np = Hp * Wp

    # (1x1 embedding Conv2d -> 3 ch) and (patch Conv2d 3 -> hidden, k=P, s=P) folded into
    # a single matmul with precombined weights; im2col of the input done once here.
    patches = (spatial_features
               .reshape(B, C, Hp, P, Wp, P)
               .transpose(0, 2, 4, 1, 3, 5)          # (B, Hp, Wp, C, P, P)
               .reshape(B * Np, C * P * P))
    tok = linear(patches, params["embed_w"], params["embed_b"]).reshape(B, Np, hidden)

    # prepend CLS token, add position embeddings (dropout is identity in eval mode)
    cls = jnp.broadcast_to(params["cls"].astype(jnp.bfloat16), (B, 1, hidden))
    seq = jnp.concatenate([cls, tok], axis=1) + params["pos"].astype(jnp.bfloat16)

    for lp in params["layers"]:
        seq = vit_layer(seq, lp, cfg["num_heads"])

    # final layernorm of ViTModel
    seq = layernorm(seq.reshape(-1, hidden), params["lnf_g"], params["lnf_b"])
    seq = seq.reshape(B, Np + 1, hidden)

    # drop CLS; small NHWC->NCHW permute of the low-res feature map (Hp x Wp)
    feat = seq[:, 1:, :].reshape(B, Hp, Wp, hidden).transpose(0, 3, 1, 2)

    # self.proj: Identity (output_channels == hidden_size)
    # self.upsample: bilinear, align_corners=False (original hard-codes (468, 468))
    return bilinear_upsample(feat, cfg["upsample_size"])


# ----------------------------------------------------------------------------
# Deterministic synthetic parameters
# ----------------------------------------------------------------------------

def _fold_patch_embedding(emb_w, emb_b, patch_w, patch_b, P, C, hidden):
    """Fold the 1x1 embedding conv into the patch-embedding conv (both linear)."""
    pw = patch_w.reshape(3, P, P, hidden)
    w_comb = jnp.einsum("ck,kabh->cabh", emb_w, pw).reshape(C * P * P, hidden)
    b_comb = patch_b + jnp.einsum("k,kabh->h", emb_b, pw)
    return w_comb, b_comb


def init_params(key, cfg):
    hidden, inter = cfg["hidden"], cfg["intermediate"]
    P, C = cfg["patch_size"], cfg["input_channels"]
    Np = (cfg["image_size"] // P) ** 2
    ks = iter(jax.random.split(key, 64))

    def w(shape, std=0.02):
        return jax.random.normal(next(ks), shape, jnp.float32) * std

    emb_w = w((C, 3))
    emb_b = jnp.zeros((3,), jnp.float32)
    patch_w = w((3 * P * P, hidden))
    patch_b = jnp.zeros((hidden,), jnp.float32)
    embed_w, embed_b = _fold_patch_embedding(emb_w, emb_b, patch_w, patch_b, P, C, hidden)

    params = {
        "embed_w": embed_w.astype(jnp.bfloat16), "embed_b": embed_b,
        "cls": w((1, 1, hidden)), "pos": w((1, Np + 1, hidden)),
        "lnf_g": jnp.ones((hidden,), jnp.float32), "lnf_b": jnp.zeros((hidden,), jnp.float32),
        "layers": [],
    }
    for _ in range(cfg["num_layers"]):
        params["layers"].append({
            "ln1_g": jnp.ones((hidden,), jnp.float32), "ln1_b": jnp.zeros((hidden,), jnp.float32),
            # concat of q/k/v projection weights -> one fused QKV matmul
            "w_qkv": w((hidden, 3 * hidden)).astype(jnp.bfloat16),
            "b_qkv": jnp.zeros((3 * hidden,), jnp.float32),
            "wo": w((hidden, hidden)).astype(jnp.bfloat16),
            "bo": jnp.zeros((hidden,), jnp.float32),
            "ln2_g": jnp.ones((hidden,), jnp.float32), "ln2_b": jnp.zeros((hidden,), jnp.float32),
            "w_fc1": w((hidden, inter)).astype(jnp.bfloat16),
            "b_fc1": jnp.zeros((inter,), jnp.float32),
            "w_fc2": w((inter, hidden)).astype(jnp.bfloat16),
            "b_fc2": jnp.zeros((hidden,), jnp.float32),
        })
    return params


if __name__ == "__main__":
    cfg = {
        "input_channels": 4,
        "patch_size": 4,
        "image_size": 16,
        "hidden": 32,
        "num_heads": 4,
        "num_layers": 2,
        "intermediate": 64,
        "upsample_size": (16, 16),   # original module hard-codes (468, 468)
    }

    key = jax.random.PRNGKey(0)
    k_params, k_x = jax.random.split(key)
    params = init_params(k_params, cfg)

    # data_dict['spatial_features']: NCHW
    spatial_features = jax.random.normal(k_x, (2, cfg["input_channels"], 16, 16), jnp.float32)

    fwd = jax.jit(lambda sf, prm: vit_backbone_forward(sf, prm, cfg))
    out = fwd(spatial_features, params)
    out = jax.block_until_ready(out)

    assert out.shape == (2, cfg["hidden"], 16, 16), out.shape
    assert bool(jnp.all(jnp.isfinite(out)))
    print("KERNEL_OK")
</pallas_src>

<mosaic_0001>
module attributes {stable_mosaic.version = 11 : i64} {
  func.func @_linear_kernel(%arg0: i32, %arg1: i32, %arg2: i32, %arg3: memref<32x64xbf16, #tpu.memory_space<vmem>>, %arg4: memref<64x32xbf16, #tpu.memory_space<vmem>>, %arg5: memref<1x32xf32, #tpu.memory_space<vmem>>, %arg6: memref<32x32xbf16, #tpu.memory_space<vmem>>, %arg7: memref<32x32xf32, #tpu.memory_space<vmem>>) attributes {dimension_semantics = [#tpu.dimension_semantics<parallel>, #tpu.dimension_semantics<parallel>, #tpu.dimension_semantics<arbitrary>], iteration_bounds = array<i64: 1, 1, 1>, scalar_prefetch = 0 : i64, scratch_operands = 1 : i64, tpu.core_type = #tpu.core_type<tc>, window_params = [{transform_indices = @transform_0, window_bounds = array<i64: 32, 64>}, {transform_indices = @transform_1, window_bounds = array<i64: 64, 32>}, {transform_indices = @transform_2, window_bounds = array<i64: 1, 32>}, {transform_indices = @transform_3, window_bounds = array<i64: 32, 32>}]} {
    %c0_i32 = arith.constant 0 : i32
    %0 = arith.cmpi eq, %arg2, %c0_i32 : i32
    %1 = arith.extui %0 : i1 to i32
    %c0_i32_0 = arith.constant 0 : i32
    %2 = arith.cmpi ne, %1, %c0_i32_0 : i32
    scf.if %2 {
      %cst_10 = arith.constant 0.000000e+00 : f32
      %12 = vector.broadcast %cst_10 : f32 to vector<32x32xf32>
      %c0_11 = arith.constant 0 : index
      %c0_12 = arith.constant 0 : index
      %13 = vector.load %arg7[%c0_11, %c0_12] : memref<32x32xf32, #tpu.memory_space<vmem>>, vector<32x32xf32>
      tpu.vector_store %arg7[%c0_11, %c0_12], %12 {strides = array<i32>} : memref<32x32xf32, #tpu.memory_space<vmem>>, vector<32x32xf32>,
    } else {
    }
    %c0 = arith.constant 0 : index
    %c0_1 = arith.constant 0 : index
    %3 = vector.load %arg7[%c0, %c0_1] : memref<32x32xf32, #tpu.memory_space<vmem>>, vector<32x32xf32>
    %c0_2 = arith.constant 0 : index
    %c0_3 = arith.constant 0 : index
    %4 = vector.load %arg3[%c0_2, %c0_3] : memref<32x64xbf16, #tpu.memory_space<vmem>>, vector<32x64xbf16>
    %c0_4 = arith.constant 0 : index
    %c0_5 = arith.constant 0 : index
    %5 = vector.load %arg4[%c0_4, %c0_5] : memref<64x32xbf16, #tpu.memory_space<vmem>>, vector<64x32xbf16>
    %cst = arith.constant dense<0.000000e+00> : vector<32x32xf32>
    %6 = tpu.matmul %4, %5, %cst {dimension_numbers = #tpu.dot_dimension_numbers<[1], [0], [0], [1], [0, 0, 1, 1], [], []>} : vector<32x64xbf16>, vector<64x32xbf16>, vector<32x32xf32> -> vector<32x32xf32>
    %7 = arith.addf %3, %6 : vector<32x32xf32>
    %c0_6 = arith.constant 0 : index
    %c0_7 = arith.constant 0 : index
    %8 = vector.load %arg7[%c0_6, %c0_7] : memref<32x32xf32, #tpu.memory_space<vmem>>, vector<32x32xf32>
    tpu.vector_store %arg7[%c0_6, %c0_7], %7 {strides = array<i32>} : memref<32x32xf32, #tpu.memory_space<vmem>>, vector<32x32xf32>,
    %c0_i32_8 = arith.constant 0 : i32
    %9 = arith.cmpi eq, %arg2, %c0_i32_8 : i32
    %10 = arith.extui %9 : i1 to i32
    %c0_i32_9 = arith.constant 0 : i32
    %11 = arith.cmpi ne, %10, %c0_i32_9 : i32
    scf.if %11 {
      %c0_10 = arith.constant 0 : index
      %c0_11 = arith.constant 0 : index
      %12 = vector.load %arg7[%c0_10, %c0_11] : memref<32x32xf32, #tpu.memory_space<vmem>>, vector<32x32xf32>
      %c0_12 = arith.constant 0 : index
      %c0_13 = arith.constant 0 : index
      %13 = vector.load %arg5[%c0_12, %c0_13] : memref<1x32xf32, #tpu.memory_space<vmem>>, vector<1x32xf32>
      %14 = vector.broadcast %13 : vector<1x32xf32> to vector<32x32xf32>
      %15 = arith.addf %12, %14 : vector<32x32xf32>
      %16 = arith.truncf %15 : vector<32x32xf32> to vector<32x32xbf16>
      %c0_14 = arith.constant 0 : index
      %c0_15 = arith.constant 0 : index
      %17 = vector.load %arg6[%c0_14, %c0_15] : memref<32x32xbf16, #tpu.memory_space<vmem>>, vector<32x32xbf16>
      tpu.vector_store %arg6[%c0_14, %c0_15], %16 {strides = array<i32>} : memref<32x32xbf16, #tpu.memory_space<vmem>>, vector<32x32xbf16>,
    } else {
    }
    return
  }
  func.func @transform_0(%arg0: i32, %arg1: i32, %arg2: i32) -> (i32, i32) {
    %c0_i32 = arith.constant 0 : i32
    return %arg0, %arg2 : i32, i32
  }
  func.func @transform_1(%arg0: i32, %arg1: i32, %arg2: i32) -> (i32, i32) {
    %c0_i32 = arith.constant 0 : i32
    return %arg2, %arg1 : i32, i32
  }
  func.func @transform_2(%arg0: i32, %arg1: i32, %arg2: i32) -> (i32, i32) {
    %c0_i32 = arith.constant 0 : i32
    %c0_i32_0 = arith.constant 0 : i32
    return %c0_i32, %arg1 : i32, i32
  }
  func.func @transform_3(%arg0: i32, %arg1: i32, %arg2: i32) -> (i32, i32) {
    %c0_i32 = arith.constant 0 : i32
    return %arg0, %arg1 : i32, i32
  }
}

module attributes {stable_mosaic.version = 11 : i64} {
  func.func @_ln_linear_kernel(%arg0: i32, %arg1: i32, %arg2: memref<34x32xbf16, #tpu.memory_space<vmem>>, %arg3: memref<1x32xf32, #tpu.memory_space<vmem>>, %arg4: memref<1x32xf32, #tpu.memory_space<vmem>>, %arg5: memref<32x96xbf16, #tpu.memory_space<vmem>>, %arg6: memref<1x96xf32, #tpu.memory_space<vmem>>, %arg7: memref<34x96xbf16, #tpu.memory_space<vmem>>) attributes {dimension_semantics = [#tpu.dimension_semantics<parallel>, #tpu.dimension_semantics<parallel>], iteration_bounds = array<i64: 1, 1>, scalar_prefetch = 0 : i64, scratch_operands = 0 : i64, tpu.core_type = #tpu.core_type<tc>, window_params = [{transform_indices = @transform_0, window_bounds = array<i64: 34, 32>}, {pipeline_mode = #tpu.pipeline_mode<synchronous>, transform_indices = @transform_1, window_bounds = array<i64: 1, 32>}, {pipeline_mode = #tpu.pipeline_mode<synchronous>, transform_indices = @transform_2, window_bounds = array<i64: 1, 32>}, {transform_indices = @transform_3, window_bounds = array<i64: 32, 96>}, {transform_indices = @transform_4, window_bounds = array<i64: 1, 96>}, {transform_indices = @transform_5, window_bounds = array<i64: 34, 96>}]} {
    %c0 = arith.constant 0 : index
    %c0_0 = arith.constant 0 : index
    %0 = vector.load %arg2[%c0, %c0_0] : memref<34x32xbf16, #tpu.memory_space<vmem>>, vector<34x32xbf16>
    %1 = arith.extf %0 : vector<34x32xbf16> to vector<34x32xf32>
    %cst = arith.constant dense<0.000000e+00> : vector<34xf32>
    %2 = vector.multi_reduction <add>, %1, %cst [1] : vector<34x32xf32> to vector<34xf32>
    %3 = vector.shape_cast %2 : vector<34xf32> to vector<34x1xf32>
    %cst_1 = arith.constant 3.200000e+01 : f32
    %4 = vector.broadcast %cst_1 : f32 to vector<34x1xf32>
    %5 = arith.divf %3, %4 : vector<34x1xf32>
    %6 = vector.broadcast %5 : vector<34x1xf32> to vector<34x32xf32>
    %7 = arith.subf %1, %6 : vector<34x32xf32>
    %8 = arith.mulf %7, %7 : vector<34x32xf32>
    %cst_2 = arith.constant dense<0.000000e+00> : vector<34xf32>
    %9 = vector.multi_reduction <add>, %8, %cst_2 [1] : vector<34x32xf32> to vector<34xf32>
    %10 = vector.shape_cast %9 : vector<34xf32> to vector<34x1xf32>
    %cst_3 = arith.constant 3.200000e+01 : f32
    %11 = vector.broadcast %cst_3 : f32 to vector<34x1xf32>
    %12 = arith.divf %10, %11 : vector<34x1xf32>
    %13 = vector.broadcast %5 : vector<34x1xf32> to vector<34x32xf32>
    %14 = arith.subf %1, %13 : vector<34x32xf32>
    %cst_4 = arith.constant 9.99999996E-13 : f32
    %15 = vector.broadcast %cst_4 : f32 to vector<34x1xf32>
    %16 = arith.addf %12, %15 : vector<34x1xf32>
    %17 = math.rsqrt %16 : vector<34x1xf32>
    %18 = vector.broadcast %17 : vector<34x1xf32> to vector<34x32xf32>
    %19 = arith.mulf %14, %18 : vector<34x32xf32>
    %c0_5 = arith.constant 0 : index
    %c0_6 = arith.constant 0 : index
    %20 = vector.load %arg3[%c0_5, %c0_6] : memref<1x32xf32, #tpu.memory_space<vmem>>, vector<1x32xf32>
    %21 = vector.broadcast %20 : vector<1x32xf32> to vector<34x32xf32>
    %22 = arith.mulf %19, %21 : vector<34x32xf32>
    %c0_7 = arith.constant 0 : index
    %c0_8 = arith.constant 0 : index
    %23 = vector.load %arg4[%c0_7, %c0_8] : memref<1x32xf32, #tpu.memory_space<vmem>>, vector<1x32xf32>
    %24 = vector.broadcast %23 : vector<1x32xf32> to vector<34x32xf32>
    %25 = arith.addf %22, %24 : vector<34x32xf32>
    %26 = arith.truncf %25 : vector<34x32xf32> to vector<34x32xbf16>
    %c0_9 = arith.constant 0 : index
    %c0_10 = arith.constant 0 : index
    %27 = vector.load %arg5[%c0_9, %c0_10] : memref<32x96xbf16, #tpu.memory_space<vmem>>, vector<32x96xbf16>
    %cst_11 = arith.constant dense<0.000000e+00> : vector<34x96xf32>
    %28 = tpu.matmul %26, %27, %cst_11 {dimension_numbers = #tpu.dot_dimension_numbers<[1], [0], [0], [1], [0, 0, 1, 1], [], []>} : vector<34x32xbf16>, vector<32x96xbf16>, vector<34x96xf32> -> vector<34x96xf32>
    %c0_12 = arith.constant 0 : index
    %c0_13 = arith.constant 0 : index
    %29 = vector.load %arg6[%c0_12, %c0_13] : memref<1x96xf32, #tpu.memory_space<vmem>>, vector<1x96xf32>
    %30 = vector.broadcast %29 : vector<1x96xf32> to vector<34x96xf32>
    %31 = arith.addf %28, %30 : vector<34x96xf32>
    %32 = arith.truncf %31 : vector<34x96xf32> to vector<34x96xbf16>
    %c0_14 = arith.constant 0 : index
    %c0_15 = arith.constant 0 : index
    %33 = vector.load %arg7[%c0_14, %c0_15] : memref<34x96xbf16, #tpu.memory_space<vmem>>, vector<34x96xbf16>
    tpu.vector_store %arg7[%c0_14, %c0_15], %32 {strides = array<i32>} : memref<34x96xbf16, #tpu.memory_space<vmem>>, vector<34x96xbf16>,
    return
  }
  func.func @transform_0(%arg0: i32, %arg1: i32) -> (i32, i32) {
    %c0_i32 = arith.constant 0 : i32
    %c0_i32_0 = arith.constant 0 : i32
    return %arg0, %c0_i32 : i32, i32
  }
  func.func @transform_1(%arg0: i32, %arg1: i32) -> (i32, i32) {
    %c0_i32 = arith.constant 0 : i32
    %c0_i32_0 = arith.constant 0 : i32
    %c0_i32_1 = arith.constant 0 : i32
    return %c0_i32, %c0_i32_0 : i32, i32
  }
  func.func @transform_2(%arg0: i32, %arg1: i32) -> (i32, i32) {
    %c0_i32 = arith.constant 0 : i32
    %c0_i32_0 = arith.constant 0 : i32
    %c0_i32_1 = arith.constant 0 : i32
    return %c0_i32, %c0_i32_0 : i32, i32
  }
  func.func @transform_3(%arg0: i32, %arg1: i32) -> (i32, i32) {
    %c0_i32 = arith.constant 0 : i32
    %c0_i32_0 = arith.constant 0 : i32
    return %c0_i32, %arg1 : i32, i32
  }
  func.func @transform_4(%arg0: i32, %arg1: i32) -> (i32, i32) {
    %c0_i32 = arith.constant 0 : i32
    %c0_i32_0 = arith.constant 0 : i32
    return %c0_i32, %arg1 : i32, i32
  }
  func.func @transform_5(%arg0: i32, %arg1: i32) -> (i32, i32) {
    %c0_i32 = arith.constant 0 : i32
    return %arg0, %arg1 : i32, i32
  }
}

module attributes {stable_mosaic.version = 11 : i64} {
  func.func @_attn_kernel(%arg0: i32, %arg1: memref<1x4x17x8xbf16, #tpu.memory_space<vmem>>, %arg2: memref<1x4x17x8xbf16, #tpu.memory_space<vmem>>, %arg3: memref<1x4x17x8xbf16, #tpu.memory_space<vmem>>, %arg4: memref<1x4x17x8xbf16, #tpu.memory_space<vmem>>) attributes {dimension_semantics = [#tpu.dimension_semantics<parallel>], iteration_bounds = array<i64: 2>, scalar_prefetch = 0 : i64, scratch_operands = 0 : i64, tpu.core_type = #tpu.core_type<tc>, window_params = [{transform_indices = @transform_0, window_bounds = array<i64: 1, 4, 17, 8>}, {transform_indices = @transform_1, window_bounds = array<i64: 1, 4, 17, 8>}, {transform_indices = @transform_2, window_bounds = array<i64: 1, 4, 17, 8>}, {transform_indices = @transform_3, window_bounds = array<i64: 1, 4, 17, 8>}]} {
    %c0 = arith.constant 0 : index
    %c0_0 = arith.constant 0 : index
    %c0_1 = arith.constant 0 : index
    %c0_2 = arith.constant 0 : index
    %0 = vector.load %arg1[%c0, %c0_0, %c0_1, %c0_2] : memref<1x4x17x8xbf16, #tpu.memory_space<vmem>>, vector<1x4x17x8xbf16>
    %1 = vector.shape_cast %0 : vector<1x4x17x8xbf16> to vector<4x17x8xbf16>
    %c0_3 = arith.constant 0 : index
    %c0_4 = arith.constant 0 : index
    %c0_5 = arith.constant 0 : index
    %c0_6 = arith.constant 0 : index
    %2 = vector.load %arg2[%c0_3, %c0_4, %c0_5, %c0_6] : memref<1x4x17x8xbf16, #tpu.memory_space<vmem>>, vector<1x4x17x8xbf16>
    %3 = vector.shape_cast %2 : vector<1x4x17x8xbf16> to vector<4x17x8xbf16>
    %c0_7 = arith.constant 0 : index
    %c0_8 = arith.constant 0 : index
    %c0_9 = arith.constant 0 : index
    %c0_10 = arith.constant 0 : index
    %4 = vector.load %arg3[%c0_7, %c0_8, %c0_9, %c0_10] : memref<1x4x17x8xbf16, #tpu.memory_space<vmem>>, vector<1x4x17x8xbf16>
    %5 = vector.shape_cast %4 : vector<1x4x17x8xbf16> to vector<4x17x8xbf16>
    "tpu.trace_start"() <{level = 10 : i32, message = "hqd,hkd->hqk"}> : () -> ()
    %cst = arith.constant dense<0.000000e+00> : vector<4x17x17xf32>
    %6 = tpu.matmul %1, %3, %cst {dimension_numbers = #tpu.dot_dimension_numbers<[2], [2], [1], [1], [0, 0, 0, 1, 1, 1], [0], [0]>} : vector<4x17x8xbf16>, vector<4x17x8xbf16>, vector<4x17x17xf32> -> vector<4x17x17xf32>
    "tpu.trace_stop"() : () -> ()
    %cst_11 = arith.constant 0.353553385 : f32
    %7 = vector.broadcast %cst_11 : f32 to vector<4x17x17xf32>
    %8 = arith.mulf %6, %7 : vector<4x17x17xf32>
    %cst_12 = arith.constant dense<0xFF800000> : vector<4x17xf32>
    %9 = vector.multi_reduction <maximumf>, %8, %cst_12 [2] : vector<4x17x17xf32> to vector<4x17xf32>
    %10 = vector.shape_cast %9 : vector<4x17xf32> to vector<4x17x1xf32>
    %11 = vector.broadcast %10 : vector<4x17x1xf32> to vector<4x17x17xf32>
    %12 = arith.subf %8, %11 : vector<4x17x17xf32>
    %13 = math.exp %12 : vector<4x17x17xf32>
    %cst_13 = arith.constant dense<0.000000e+00> : vector<4x17xf32>
    %14 = vector.multi_reduction <add>, %13, %cst_13 [2] : vector<4x17x17xf32> to vector<4x17xf32>
    %15 = vector.shape_cast %14 : vector<4x17xf32> to vector<4x17x1xf32>
    %16 = tpu.reciprocal %15 {approx = true} : vector<4x17x1xf32> -> vector<4x17x1xf32>
    %17 = vector.broadcast %16 : vector<4x17x1xf32> to vector<4x17x17xf32>
    %18 = arith.mulf %13, %17 : vector<4x17x17xf32>
    %19 = arith.truncf %18 : vector<4x17x17xf32> to vector<4x17x17xbf16>
    "tpu.trace_start"() <{level = 10 : i32, message = "hqk,hkd->hqd"}> : () -> ()
    %cst_14 = arith.constant dense<0.000000e+00> : vector<4x17x8xf32>
    %20 = tpu.matmul %19, %5, %cst_14 {dimension_numbers = #tpu.dot_dimension_numbers<[2], [1], [1], [2], [0, 0, 0, 1, 1, 2], [0], [0]>} : vector<4x17x17xbf16>, vector<4x17x8xbf16>, vector<4x17x8xf32> -> vector<4x17x8xf32>
    "tpu.trace_stop"() : () -> ()
    %21 = arith.truncf %20 : vector<4x17x8xf32> to vector<4x17x8xbf16>
    %c0_15 = arith.constant 0 : index
    %c0_16 = arith.constant 0 : index
    %c0_17 = arith.constant 0 : index
    %c0_18 = arith.constant 0 : index
    %22 = vector.load %arg4[%c0_15, %c0_16, %c0_17, %c0_18] : memref<1x4x17x8xbf16, #tpu.memory_space<vmem>>, vector<1x4x17x8xbf16>
    %23 = vector.shape_cast %22 : vector<1x4x17x8xbf16> to vector<4x17x8xbf16>
    %24 = vector.shape_cast %21 : vector<4x17x8xbf16> to vector<1x4x17x8xbf16>
    tpu.vector_store %arg4[%c0_15, %c0_16, %c0_17, %c0_18], %24 {strides = array<i32>} : memref<1x4x17x8xbf16, #tpu.memory_space<vmem>>, vector<1x4x17x8xbf16>,
    return
  }
  func.func @transform_0(%arg0: i32) -> (i32, i32, i32, i32) {
    %c0_i32 = arith.constant 0 : i32
    %c0_i32_0 = arith.constant 0 : i32
    %c0_i32_1 = arith.constant 0 : i32
    %c0_i32_2 = arith.constant 0 : i32
    return %arg0, %c0_i32, %c0_i32_0, %c0_i32_1 : i32, i32, i32, i32
  }
  func.func @transform_1(%arg0: i32) -> (i32, i32, i32, i32) {
    %c0_i32 = arith.constant 0 : i32
    %c0_i32_0 = arith.constant 0 : i32
    %c0_i32_1 = arith.constant 0 : i32
    %c0_i32_2 = arith.constant 0 : i32
    return %arg0, %c0_i32, %c0_i32_0, %c0_i32_1 : i32, i32, i32, i32
  }
  func.func @transform_2(%arg0: i32) -> (i32, i32, i32, i32) {
    %c0_i32 = arith.constant 0 : i32
    %c0_i32_0 = arith.constant 0 : i32
    %c0_i32_1 = arith.constant 0 : i32
    %c0_i32_2 = arith.constant 0 : i32
    return %arg0, %c0_i32, %c0_i32_0, %c0_i32_1 : i32, i32, i32, i32
  }
  func.func @transform_3(%arg0: i32) -> (i32, i32, i32, i32) {
    %c0_i32 = arith.constant 0 : i32
    %c0_i32_0 = arith.constant 0 : i32
    %c0_i32_1 = arith.constant 0 : i32
    %c0_i32_2 = arith.constant 0 : i32
    return %arg0, %c0_i32, %c0_i32_0, %c0_i32_1 : i32, i32, i32, i32
  }
}

module attributes {stable_mosaic.version = 11 : i64} {
  func.func @_layernorm_kernel(%arg0: i32, %arg1: memref<34x32xbf16, #tpu.memory_space<vmem>>, %arg2: memref<1x32xf32, #tpu.memory_space<vmem>>, %arg3: memref<1x32xf32, #tpu.memory_space<vmem>>, %arg4: memref<34x32xbf16, #tpu.memory_space<vmem>>) attributes {dimension_semantics = [#tpu.dimension_semantics<parallel>], iteration_bounds = array<i64: 1>, scalar_prefetch = 0 : i64, scratch_operands = 0 : i64, tpu.core_type = #tpu.core_type<tc>, window_params = [{transform_indices = @transform_0, window_bounds = array<i64: 34, 32>}, {pipeline_mode = #tpu.pipeline_mode<synchronous>, transform_indices = @transform_1, window_bounds = array<i64: 1, 32>}, {pipeline_mode = #tpu.pipeline_mode<synchronous>, transform_indices = @transform_2, window_bounds = array<i64: 1, 32>}, {transform_indices = @transform_3, window_bounds = array<i64: 34, 32>}]} {
    %c0 = arith.constant 0 : index
    %c0_0 = arith.constant 0 : index
    %0 = vector.load %arg1[%c0, %c0_0] : memref<34x32xbf16, #tpu.memory_space<vmem>>, vector<34x32xbf16>
    %1 = arith.extf %0 : vector<34x32xbf16> to vector<34x32xf32>
    %cst = arith.constant dense<0.000000e+00> : vector<34xf32>
    %2 = vector.multi_reduction <add>, %1, %cst [1] : vector<34x32xf32> to vector<34xf32>
    %3 = vector.shape_cast %2 : vector<34xf32> to vector<34x1xf32>
    %cst_1 = arith.constant 3.200000e+01 : f32
    %4 = vector.broadcast %cst_1 : f32 to vector<34x1xf32>
    %5 = arith.divf %3, %4 : vector<34x1xf32>
    %6 = vector.broadcast %5 : vector<34x1xf32> to vector<34x32xf32>
    %7 = arith.subf %1, %6 : vector<34x32xf32>
    %8 = arith.mulf %7, %7 : vector<34x32xf32>
    %cst_2 = arith.constant dense<0.000000e+00> : vector<34xf32>
    %9 = vector.multi_reduction <add>, %8, %cst_2 [1] : vector<34x32xf32> to vector<34xf32>
    %10 = vector.shape_cast %9 : vector<34xf32> to vector<34x1xf32>
    %cst_3 = arith.constant 3.200000e+01 : f32
    %11 = vector.broadcast %cst_3 : f32 to vector<34x1xf32>
    %12 = arith.divf %10, %11 : vector<34x1xf32>
    %13 = vector.broadcast %5 : vector<34x1xf32> to vector<34x32xf32>
    %14 = arith.subf %1, %13 : vector<34x32xf32>
    %cst_4 = arith.constant 9.99999996E-13 : f32
    %15 = vector.broadcast %cst_4 : f32 to vector<34x1xf32>
    %16 = arith.addf %12, %15 : vector<34x1xf32>
    %17 = math.rsqrt %16 : vector<34x1xf32>
    %18 = vector.broadcast %17 : vector<34x1xf32> to vector<34x32xf32>
    %19 = arith.mulf %14, %18 : vector<34x32xf32>
    %c0_5 = arith.constant 0 : index
    %c0_6 = arith.constant 0 : index
    %20 = vector.load %arg2[%c0_5, %c0_6] : memref<1x32xf32, #tpu.memory_space<vmem>>, vector<1x32xf32>
    %21 = vector.broadcast %20 : vector<1x32xf32> to vector<34x32xf32>
    %22 = arith.mulf %19, %21 : vector<34x32xf32>
    %c0_7 = arith.constant 0 : index
    %c0_8 = arith.constant 0 : index
    %23 = vector.load %arg3[%c0_7, %c0_8] : memref<1x32xf32, #tpu.memory_space<vmem>>, vector<1x32xf32>
    %24 = vector.broadcast %23 : vector<1x32xf32> to vector<34x32xf32>
    %25 = arith.addf %22, %24 : vector<34x32xf32>
    %26 = arith.truncf %25 : vector<34x32xf32> to vector<34x32xbf16>
    %c0_9 = arith.constant 0 : index
    %c0_10 = arith.constant 0 : index
    %27 = vector.load %arg4[%c0_9, %c0_10] : memref<34x32xbf16, #tpu.memory_space<vmem>>, vector<34x32xbf16>
    tpu.vector_store %arg4[%c0_9, %c0_10], %26 {strides = array<i32>} : memref<34x32xbf16, #tpu.memory_space<vmem>>, vector<34x32xbf16>,
    return
  }
  func.func @transform_0(%arg0: i32) -> (i32, i32) {
    %c0_i32 = arith.constant 0 : i32
    %c0_i32_0 = arith.constant 0 : i32
    return %arg0, %c0_i32 : i32, i32
  }
  func.func @transform_1(%arg0: i32) -> (i32, i32) {
    %c0_i32 = arith.constant 0 : i32
    %c0_i32_0 = arith.constant 0 : i32
    %c0_i32_1 = arith.constant 0 : i32
    return %c0_i32, %c0_i32_0 : i32, i32
  }
  func.func @transform_2(%arg0: i32) -> (i32, i32) {
    %c0_i32 = arith.constant 0 : i32
    %c0_i32_0 = arith.constant 0 : i32
    %c0_i32_1 = arith.constant 0 : i32
    return %c0_i32, %c0_i32_0 : i32, i32
  }
  func.func @transform_3(%arg0: i32) -> (i32, i32) {
    %c0_i32 = arith.constant 0 : i32
    %c0_i32_0 = arith.constant 0 : i32
    return %arg0, %c0_i32 : i32, i32
  }
}

module attributes {stable_mosaic.version = 11 : i64} {
  func.func @_mlp_kernel(%arg0: i32, %arg1: memref<34x32xbf16, #tpu.memory_space<vmem>>, %arg2: memref<1x32xf32, #tpu.memory_space<vmem>>, %arg3: memref<1x32xf32, #tpu.memory_space<vmem>>, %arg4: memref<32x64xbf16, #tpu.memory_space<vmem>>, %arg5: memref<1x64xf32, #tpu.memory_space<vmem>>, %arg6: memref<64x32xbf16, #tpu.memory_space<vmem>>, %arg7: memref<1x32xf32, #tpu.memory_space<vmem>>, %arg8: memref<34x32xbf16, #tpu.memory_space<vmem>>) attributes {dimension_semantics = [#tpu.dimension_semantics<parallel>], iteration_bounds = array<i64: 1>, scalar_prefetch = 0 : i64, scratch_operands = 0 : i64, tpu.core_type = #tpu.core_type<tc>, window_params = [{transform_indices = @transform_0, window_bounds = array<i64: 34, 32>}, {pipeline_mode = #tpu.pipeline_mode<synchronous>, transform_indices = @transform_1, window_bounds = array<i64: 1, 32>}, {pipeline_mode = #tpu.pipeline_mode<synchronous>, transform_indices = @transform_2, window_bounds = array<i64: 1, 32>}, {pipeline_mode = #tpu.pipeline_mode<synchronous>, transform_indices = @transform_3, window_bounds = array<i64: 32, 64>}, {pipeline_mode = #tpu.pipeline_mode<synchronous>, transform_indices = @transform_4, window_bounds = array<i64: 1, 64>}, {pipeline_mode = #tpu.pipeline_mode<synchronous>, transform_indices = @transform_5, window_bounds = array<i64: 64, 32>}, {pipeline_mode = #tpu.pipeline_mode<synchronous>, transform_indices = @transform_6, window_bounds = array<i64: 1, 32>}, {transform_indices = @transform_7, window_bounds = array<i64: 34, 32>}]} {
    %c0 = arith.constant 0 : index
    %c0_0 = arith.constant 0 : index
    %0 = vector.load %arg1[%c0, %c0_0] : memref<34x32xbf16, #tpu.memory_space<vmem>>, vector<34x32xbf16>
    %1 = arith.extf %0 : vector<34x32xbf16> to vector<34x32xf32>
    %cst = arith.constant dense<0.000000e+00> : vector<34xf32>
    %2 = vector.multi_reduction <add>, %1, %cst [1] : vector<34x32xf32> to vector<34xf32>
    %3 = vector.shape_cast %2 : vector<34xf32> to vector<34x1xf32>
    %cst_1 = arith.constant 3.200000e+01 : f32
    %4 = vector.broadcast %cst_1 : f32 to vector<34x1xf32>
    %5 = arith.divf %3, %4 : vector<34x1xf32>
    %6 = vector.broadcast %5 : vector<34x1xf32> to vector<34x32xf32>
    %7 = arith.subf %1, %6 : vector<34x32xf32>
    %8 = arith.mulf %7, %7 : vector<34x32xf32>
    %cst_2 = arith.constant dense<0.000000e+00> : vector<34xf32>
    %9 = vector.multi_reduction <add>, %8, %cst_2 [1] : vector<34x32xf32> to vector<34xf32>
    %10 = vector.shape_cast %9 : vector<34xf32> to vector<34x1xf32>
    %cst_3 = arith.constant 3.200000e+01 : f32
    %11 = vector.broadcast %cst_3 : f32 to vector<34x1xf32>
    %12 = arith.divf %10, %11 : vector<34x1xf32>
    %13 = vector.broadcast %5 : vector<34x1xf32> to vector<34x32xf32>
    %14 = arith.subf %1, %13 : vector<34x32xf32>
    %cst_4 = arith.constant 9.99999996E-13 : f32
    %15 = vector.broadcast %cst_4 : f32 to vector<34x1xf32>
    %16 = arith.addf %12, %15 : vector<34x1xf32>
    %17 = math.rsqrt %16 : vector<34x1xf32>
    %18 = vector.broadcast %17 : vector<34x1xf32> to vector<34x32xf32>
    %19 = arith.mulf %14, %18 : vector<34x32xf32>
    %c0_5 = arith.constant 0 : index
    %c0_6 = arith.constant 0 : index
    %20 = vector.load %arg2[%c0_5, %c0_6] : memref<1x32xf32, #tpu.memory_space<vmem>>, vector<1x32xf32>
    %21 = vector.broadcast %20 : vector<1x32xf32> to vector<34x32xf32>
    %22 = arith.mulf %19, %21 : vector<34x32xf32>
    %c0_7 = arith.constant 0 : index
    %c0_8 = arith.constant 0 : index
    %23 = vector.load %arg3[%c0_7, %c0_8] : memref<1x32xf32, #tpu.memory_space<vmem>>, vector<1x32xf32>
    %24 = vector.broadcast %23 : vector<1x32xf32> to vector<34x32xf32>
    %25 = arith.addf %22, %24 : vector<34x32xf32>
    %26 = arith.truncf %25 : vector<34x32xf32> to vector<34x32xbf16>
    %c0_9 = arith.constant 0 : index
    %c0_10 = arith.constant 0 : index
    %27 = vector.load %arg4[%c0_9, %c0_10] : memref<32x64xbf16, #tpu.memory_space<vmem>>, vector<32x64xbf16>
    %cst_11 = arith.constant dense<0.000000e+00> : vector<34x64xf32>
    %28 = tpu.matmul %26, %27, %cst_11 {dimension_numbers = #tpu.dot_dimension_numbers<[1], [0], [0], [1], [0, 0, 1, 1], [], []>} : vector<34x32xbf16>, vector<32x64xbf16>, vector<34x64xf32> -> vector<34x64xf32>
    %c0_12 = arith.constant 0 : index
    %c0_13 = arith.constant 0 : index
    %29 = vector.load %arg5[%c0_12, %c0_13] : memref<1x64xf32, #tpu.memory_space<vmem>>, vector<1x64xf32>
    %30 = vector.broadcast %29 : vector<1x64xf32> to vector<34x64xf32>
    %31 = arith.addf %28, %30 : vector<34x64xf32>
    %32 = arith.mulf %31, %31 : vector<34x64xf32>
    %33 = arith.mulf %31, %32 : vector<34x64xf32>
    %cst_14 = arith.constant 4.471500e-02 : f32
    %34 = vector.broadcast %cst_14 : f32 to vector<34x64xf32>
    %35 = arith.mulf %34, %33 : vector<34x64xf32>
    %36 = arith.addf %31, %35 : vector<34x64xf32>
    %cst_15 = arith.constant 0.797884583 : f32
    %37 = vector.broadcast %cst_15 : f32 to vector<34x64xf32>
    %38 = arith.mulf %37, %36 : vector<34x64xf32>
    %39 = math.tanh %38 : vector<34x64xf32>
    %cst_16 = arith.constant 1.000000e+00 : f32
    %40 = vector.broadcast %cst_16 : f32 to vector<34x64xf32>
    %41 = arith.addf %40, %39 : vector<34x64xf32>
    %cst_17 = arith.constant 5.000000e-01 : f32
    %42 = vector.broadcast %cst_17 : f32 to vector<34x64xf32>
    %43 = arith.mulf %42, %41 : vector<34x64xf32>
    %44 = arith.mulf %31, %43 : vector<34x64xf32>
    %45 = arith.truncf %44 : vector<34x64xf32> to vector<34x64xbf16>
    %c0_18 = arith.constant 0 : index
    %c0_19 = arith.constant 0 : index
    %46 = vector.load %arg6[%c0_18, %c0_19] : memref<64x32xbf16, #tpu.memory_space<vmem>>, vector<64x32xbf16>
    %cst_20 = arith.constant dense<0.000000e+00> : vector<34x32xf32>
    %47 = tpu.matmul %45, %46, %cst_20 {dimension_numbers = #tpu.dot_dimension_numbers<[1], [0], [0], [1], [0, 0, 1, 1], [], []>} : vector<34x64xbf16>, vector<64x32xbf16>, vector<34x32xf32> -> vector<34x32xf32>
    %c0_21 = arith.constant 0 : index
    %c0_22 = arith.constant 0 : index
    %48 = vector.load %arg7[%c0_21, %c0_22] : memref<1x32xf32, #tpu.memory_space<vmem>>, vector<1x32xf32>
    %49 = vector.broadcast %48 : vector<1x32xf32> to vector<34x32xf32>
    %50 = arith.addf %47, %49 : vector<34x32xf32>
    %51 = arith.addf %1, %50 : vector<34x32xf32>
    %52 = arith.truncf %51 : vector<34x32xf32> to vector<34x32xbf16>
    %c0_23 = arith.constant 0 : index
    %c0_24 = arith.constant 0 : index
    %53 = vector.load %arg8[%c0_23, %c0_24] : memref<34x32xbf16, #tpu.memory_space<vmem>>, vector<34x32xbf16>
    tpu.vector_store %arg8[%c0_23, %c0_24], %52 {strides = array<i32>} : memref<34x32xbf16, #tpu.memory_space<vmem>>, vector<34x32xbf16>,
    return
  }
  func.func @transform_0(%arg0: i32) -> (i32, i32) {
    %c0_i32 = arith.constant 0 : i32
    %c0_i32_0 = arith.constant 0 : i32
    return %arg0, %c0_i32 : i32, i32
  }
  func.func @transform_1(%arg0: i32) -> (i32, i32) {
    %c0_i32 = arith.constant 0 : i32
    %c0_i32_0 = arith.constant 0 : i32
    %c0_i32_1 = arith.constant 0 : i32
    return %c0_i32, %c0_i32_0 : i32, i32
  }
  func.func @transform_2(%arg0: i32) -> (i32, i32) {
    %c0_i32 = arith.constant 0 : i32
    %c0_i32_0 = arith.constant 0 : i32
    %c0_i32_1 = arith.constant 0 : i32
    return %c0_i32, %c0_i32_0 : i32, i32
  }
  func.func @transform_3(%arg0: i32) -> (i32, i32) {
    %c0_i32 = arith.constant 0 : i32
    %c0_i32_0 = arith.constant 0 : i32
    %c0_i32_1 = arith.constant 0 : i32
    return %c0_i32, %c0_i32_0 : i32, i32
  }
  func.func @transform_4(%arg0: i32) -> (i32, i32) {
    %c0_i32 = arith.constant 0 : i32
    %c0_i32_0 = arith.constant 0 : i32
    %c0_i32_1 = arith.constant 0 : i32
    return %c0_i32, %c0_i32_0 : i32, i32
  }
  func.func @transform_5(%arg0: i32) -> (i32, i32) {
    %c0_i32 = arith.constant 0 : i32
    %c0_i32_0 = arith.constant 0 : i32
    %c0_i32_1 = arith.constant 0 : i32
    return %c0_i32, %c0_i32_0 : i32, i32
  }
  func.func @transform_6(%arg0: i32) -> (i32, i32) {
    %c0_i32 = arith.constant 0 : i32
    %c0_i32_0 = arith.constant 0 : i32
    %c0_i32_1 = arith.constant 0 : i32
    return %c0_i32, %c0_i32_0 : i32, i32
  }
  func.func @transform_7(%arg0: i32) -> (i32, i32) {
    %c0_i32 = arith.constant 0 : i32
    %c0_i32_0 = arith.constant 0 : i32
    return %arg0, %c0_i32 : i32, i32
  }
}

module attributes {stable_mosaic.version = 11 : i64} {
  func.func @_linear_kernel(%arg0: i32, %arg1: i32, %arg2: i32, %arg3: memref<34x32xbf16, #tpu.memory_space<vmem>>, %arg4: memref<32x32xbf16, #tpu.memory_space<vmem>>, %arg5: memref<1x32xf32, #tpu.memory_space<vmem>>, %arg6: memref<34x32xbf16, #tpu.memory_space<vmem>>, %arg7: memref<34x32xbf16, #tpu.memory_space<vmem>>, %arg8: memref<34x32xf32, #tpu.memory_space<vmem>>) attributes {dimension_semantics = [#tpu.dimension_semantics<parallel>, #tpu.dimension_semantics<parallel>, #tpu.dimension_semantics<arbitrary>], iteration_bounds = array<i64: 1, 1, 1>, scalar_prefetch = 0 : i64, scratch_operands = 1 : i64, tpu.core_type = #tpu.core_type<tc>, window_params = [{transform_indices = @transform_0, window_bounds = array<i64: 34, 32>}, {transform_indices = @transform_1, window_bounds = array<i64: 32, 32>}, {transform_indices = @transform_2, window_bounds = array<i64: 1, 32>}, {transform_indices = @transform_3, window_bounds = array<i64: 34, 32>}, {transform_indices = @transform_4, window_bounds = array<i64: 34, 32>}]} {
    %c0_i32 = arith.constant 0 : i32
    %0 = arith.cmpi eq, %arg2, %c0_i32 : i32
    %1 = arith.extui %0 : i1 to i32
    %c0_i32_0 = arith.constant 0 : i32
    %2 = arith.cmpi ne, %1, %c0_i32_0 : i32
    scf.if %2 {
      %cst_10 = arith.constant 0.000000e+00 : f32
      %12 = vector.broadcast %cst_10 : f32 to vector<34x32xf32>
      %c0_11 = arith.constant 0 : index
      %c0_12 = arith.constant 0 : index
      %13 = vector.load %arg8[%c0_11, %c0_12] : memref<34x32xf32, #tpu.memory_space<vmem>>, vector<34x32xf32>
      tpu.vector_store %arg8[%c0_11, %c0_12], %12 {strides = array<i32>} : memref<34x32xf32, #tpu.memory_space<vmem>>, vector<34x32xf32>,
    } else {
    }
    %c0 = arith.constant 0 : index
    %c0_1 = arith.constant 0 : index
    %3 = vector.load %arg8[%c0, %c0_1] : memref<34x32xf32, #tpu.memory_space<vmem>>, vector<34x32xf32>
    %c0_2 = arith.constant 0 : index
    %c0_3 = arith.constant 0 : index
    %4 = vector.load %arg3[%c0_2, %c0_3] : memref<34x32xbf16, #tpu.memory_space<vmem>>, vector<34x32xbf16>
    %c0_4 = arith.constant 0 : index
    %c0_5 = arith.constant 0 : index
    %5 = vector.load %arg4[%c0_4, %c0_5] : memref<32x32xbf16, #tpu.memory_space<vmem>>, vector<32x32xbf16>
    %cst = arith.constant dense<0.000000e+00> : vector<34x32xf32>
    %6 = tpu.matmul %4, %5, %cst {dimension_numbers = #tpu.dot_dimension_numbers<[1], [0], [0], [1], [0, 0, 1, 1], [], []>} : vector<34x32xbf16>, vector<32x32xbf16>, vector<34x32xf32> -> vector<34x32xf32>
    %7 = arith.addf %3, %6 : vector<34x32xf32>
    %c0_6 = arith.constant 0 : index
    %c0_7 = arith.constant 0 : index
    %8 = vector.load %arg8[%c0_6, %c0_7] : memref<34x32xf32, #tpu.memory_space<vmem>>, vector<34x32xf32>
    tpu.vector_store %arg8[%c0_6, %c0_7], %7 {strides = array<i32>} : memref<34x32xf32, #tpu.memory_space<vmem>>, vector<34x32xf32>,
    %c0_i32_8 = arith.constant 0 : i32
    %9 = arith.cmpi eq, %arg2, %c0_i32_8 : i32
    %10 = arith.extui %9 : i1 to i32
    %c0_i32_9 = arith.constant 0 : i32
    %11 = arith.cmpi ne, %10, %c0_i32_9 : i32
    scf.if %11 {
      %c0_10 = arith.constant 0 : index
      %c0_11 = arith.constant 0 : index
      %12 = vector.load %arg8[%c0_10, %c0_11] : memref<34x32xf32, #tpu.memory_space<vmem>>, vector<34x32xf32>
      %c0_12 = arith.constant 0 : index
      %c0_13 = arith.constant 0 : index
      %13 = vector.load %arg5[%c0_12, %c0_13] : memref<1x32xf32, #tpu.memory_space<vmem>>, vector<1x32xf32>
      %14 = vector.broadcast %13 : vector<1x32xf32> to vector<34x32xf32>
      %15 = arith.addf %12, %14 : vector<34x32xf32>
      %c0_14 = arith.constant 0 : index
      %c0_15 = arith.constant 0 : index
      %16 = vector.load %arg6[%c0_14, %c0_15] : memref<34x32xbf16, #tpu.memory_space<vmem>>, vector<34x32xbf16>
      %17 = arith.extf %16 : vector<34x32xbf16> to vector<34x32xf32>
      %18 = arith.addf %15, %17 : vector<34x32xf32>
      %19 = arith.truncf %18 : vector<34x32xf32> to vector<34x32xbf16>
      %c0_16 = arith.constant 0 : index
      %c0_17 = arith.constant 0 : index
      %20 = vector.load %arg7[%c0_16, %c0_17] : memref<34x32xbf16, #tpu.memory_space<vmem>>, vector<34x32xbf16>
      tpu.vector_store %arg7[%c0_16, %c0_17], %19 {strides = array<i32>} : memref<34x32xbf16, #tpu.memory_space<vmem>>, vector<34x32xbf16>,
    } else {
    }
    return
  }
  func.func @transform_0(%arg0: i32, %arg1: i32, %arg2: i32) -> (i32, i32) {
    %c0_i32 = arith.constant 0 : i32
    return %arg0, %arg2 : i32, i32
  }
  func.func @transform_1(%arg0: i32, %arg1: i32, %arg2: i32) -> (i32, i32) {
    %c0_i32 = arith.constant 0 : i32
    return %arg2, %arg1 : i32, i32
  }
  func.func @transform_2(%arg0: i32, %arg1: i32, %arg2: i32) -> (i32, i32) {
    %c0_i32 = arith.constant 0 : i32
    %c0_i32_0 = arith.constant 0 : i32
    return %c0_i32, %arg1 : i32, i32
  }
  func.func @transform_3(%arg0: i32, %arg1: i32, %arg2: i32) -> (i32, i32) {
    %c0_i32 = arith.constant 0 : i32
    return %arg0, %arg1 : i32, i32
  }
  func.func @transform_4(%arg0: i32, %arg1: i32, %arg2: i32) -> (i32, i32) {
    %c0_i32 = arith.constant 0 : i32
    return %arg0, %arg1 : i32, i32
  }
}

module attributes {stable_mosaic.version = 11 : i64} {
  func.func @_upsample_kernel(%arg0: i32, %arg1: i32, %arg2: memref<1x8x4x4xbf16, #tpu.memory_space<vmem>>, %arg3: memref<4x16xf32, #tpu.memory_space<vmem>>, %arg4: memref<16x4xf32, #tpu.memory_space<vmem>>, %arg5: memref<1x8x16x16xf32, #tpu.memory_space<vmem>>) attributes {dimension_semantics = [#tpu.dimension_semantics<parallel>, #tpu.dimension_semantics<parallel>], iteration_bounds = array<i64: 2, 4>, scalar_prefetch = 0 : i64, scratch_operands = 0 : i64, tpu.core_type = #tpu.core_type<tc>, window_params = [{transform_indices = @transform_0, window_bounds = array<i64: 1, 8, 4, 4>}, {pipeline_mode = #tpu.pipeline_mode<synchronous>, transform_indices = @transform_1, window_bounds = array<i64: 4, 16>}, {pipeline_mode = #tpu.pipeline_mode<synchronous>, transform_indices = @transform_2, window_bounds = array<i64: 16, 4>}, {transform_indices = @transform_3, window_bounds = array<i64: 1, 8, 16, 16>}]} {
    %c0 = arith.constant 0 : index
    %c0_0 = arith.constant 0 : index
    %c0_1 = arith.constant 0 : index
    %c0_2 = arith.constant 0 : index
    %0 = vector.load %arg2[%c0, %c0_0, %c0_1, %c0_2] : memref<1x8x4x4xbf16, #tpu.memory_space<vmem>>, vector<1x8x4x4xbf16>
    %1 = vector.shape_cast %0 : vector<1x8x4x4xbf16> to vector<8x4x4xbf16>
    %2 = arith.extf %1 : vector<8x4x4xbf16> to vector<8x4x4xf32>
    %3 = vector.shape_cast %2 : vector<8x4x4xf32> to vector<32x4xf32>
    %c0_3 = arith.constant 0 : index
    %c0_4 = arith.constant 0 : index
    %4 = vector.load %arg3[%c0_3, %c0_4] : memref<4x16xf32, #tpu.memory_space<vmem>>, vector<4x16xf32>
    %cst = arith.constant dense<0.000000e+00> : vector<32x16xf32>
    %5 = tpu.matmul %3, %4, %cst {dimension_numbers = #tpu.dot_dimension_numbers<[1], [0], [0], [1], [0, 0, 1, 1], [], []>} : vector<32x4xf32>, vector<4x16xf32>, vector<32x16xf32> -> vector<32x16xf32>
    %6 = vector.shape_cast %5 : vector<32x16xf32> to vector<8x4x16xf32>
    %c0_5 = arith.constant 0 : index
    %c0_6 = arith.constant 0 : index
    %7 = vector.load %arg4[%c0_5, %c0_6] : memref<16x4xf32, #tpu.memory_space<vmem>>, vector<16x4xf32>
    %8 = vector.extract_strided_slice %6 {offsets = [0, 0, 0], sizes = [1, 4, 16], strides = [1, 1, 1]} : vector<8x4x16xf32> to vector<1x4x16xf32>
    %9 = vector.shape_cast %8 : vector<1x4x16xf32> to vector<4x16xf32>
    %cst_7 = arith.constant dense<0.000000e+00> : vector<16x16xf32>
    %10 = tpu.matmul %7, %9, %cst_7 {dimension_numbers = #tpu.dot_dimension_numbers<[1], [0], [0], [1], [0, 0, 1, 1], [], []>} : vector<16x4xf32>, vector<4x16xf32>, vector<16x16xf32> -> vector<16x16xf32>
    %c0_8 = arith.constant 0 : index
    %c0_9 = arith.constant 0 : index
    %c0_10 = arith.constant 0 : index
    %c0_11 = arith.constant 0 : index
    %11 = vector.load %arg5[%c0_8, %c0_9, %c0_10, %c0_11] : memref<1x8x16x16xf32, #tpu.memory_space<vmem>>, vector<1x1x16x16xf32>
    %12 = vector.shape_cast %11 : vector<1x1x16x16xf32> to vector<16x16xf32>
    %13 = vector.shape_cast %10 : vector<16x16xf32> to vector<1x1x16x16xf32>
    tpu.vector_store %arg5[%c0_8, %c0_9, %c0_10, %c0_11], %13 {strides = array<i32>} : memref<1x8x16x16xf32, #tpu.memory_space<vmem>>, vector<1x1x16x16xf32>,
    %14 = vector.extract_strided_slice %6 {offsets = [1, 0, 0], sizes = [1, 4, 16], strides = [1, 1, 1]} : vector<8x4x16xf32> to vector<1x4x16xf32>
    %15 = vector.shape_cast %14 : vector<1x4x16xf32> to vector<4x16xf32>
    %cst_12 = arith.constant dense<0.000000e+00> : vector<16x16xf32>
    %16 = tpu.matmul %7, %15, %cst_12 {dimension_numbers = #tpu.dot_dimension_numbers<[1], [0], [0], [1], [0, 0, 1, 1], [], []>} : vector<16x4xf32>, vector<4x16xf32>, vector<16x16xf32> -> vector<16x16xf32>
    %c0_13 = arith.constant 0 : index
    %c1 = arith.constant 1 : index
    %c0_14 = arith.constant 0 : index
    %c0_15 = arith.constant 0 : index
    %17 = vector.load %arg5[%c0_13, %c1, %c0_14, %c0_15] : memref<1x8x16x16xf32, #tpu.memory_space<vmem>>, vector<1x1x16x16xf32>
    %18 = vector.shape_cast %17 : vector<1x1x16x16xf32> to vector<16x16xf32>
    %19 = vector.shape_cast %16 : vector<16x16xf32> to vector<1x1x16x16xf32>
    tpu.vector_store %arg5[%c0_13, %c1, %c0_14, %c0_15], %19 {strides = array<i32>} : memref<1x8x16x16xf32, #tpu.memory_space<vmem>>, vector<1x1x16x16xf32>,
    %20 = vector.extract_strided_slice %6 {offsets = [2, 0, 0], sizes = [1, 4, 16], strides = [1, 1, 1]} : vector<8x4x16xf32> to vector<1x4x16xf32>
    %21 = vector.shape_cast %20 : vector<1x4x16xf32> to vector<4x16xf32>
    %cst_16 = arith.constant dense<0.000000e+00> : vector<16x16xf32>
    %22 = tpu.matmul %7, %21, %cst_16 {dimension_numbers = #tpu.dot_dimension_numbers<[1], [0], [0], [1], [0, 0, 1, 1], [], []>} : vector<16x4xf32>, vector<4x16xf32>, vector<16x16xf32> -> vector<16x16xf32>
    %c0_17 = arith.constant 0 : index
    %c2 = arith.constant 2 : index
    %c0_18 = arith.constant 0 : index
    %c0_19 = arith.constant 0 : index
    %23 = vector.load %arg5[%c0_17, %c2, %c0_18, %c0_19] : memref<1x8x16x16xf32, #tpu.memory_space<vmem>>, vector<1x1x16x16xf32>
    %24 = vector.shape_cast %23 : vector<1x1x16x16xf32> to vector<16x16xf32>
    %25 = vector.shape_cast %22 : vector<16x16xf32> to vector<1x1x16x16xf32>
    tpu.vector_store %arg5[%c0_17, %c2, %c0_18, %c0_19], %25 {strides = array<i32>} : memref<1x8x16x16xf32, #tpu.memory_space<vmem>>, vector<1x1x16x16xf32>,
    %26 = vector.extract_strided_slice %6 {offsets = [3, 0, 0], sizes = [1, 4, 16], strides = [1, 1, 1]} : vector<8x4x16xf32> to vector<1x4x16xf32>
    %27 = vector.shape_cast %26 : vector<1x4x16xf32> to vector<4x16xf32>
    %cst_20 = arith.constant dense<0.000000e+00> : vector<16x16xf32>
    %28 = tpu.matmul %7, %27, %cst_20 {dimension_numbers = #tpu.dot_dimension_numbers<[1], [0], [0], [1], [0, 0, 1, 1], [], []>} : vector<16x4xf32>, vector<4x16xf32>, vector<16x16xf32> -> vector<16x16xf32>
    %c0_21 = arith.constant 0 : index
    %c3 = arith.constant 3 : index
    %c0_22 = arith.constant 0 : index
    %c0_23 = arith.constant 0 : index
    %29 = vector.load %arg5[%c0_21, %c3, %c0_22, %c0_23] : memref<1x8x16x16xf32, #tpu.memory_space<vmem>>, vector<1x1x16x16xf32>
    %30 = vector.shape_cast %29 : vector<1x1x16x16xf32> to vector<16x16xf32>
    %31 = vector.shape_cast %28 : vector<16x16xf32> to vector<1x1x16x16xf32>
    tpu.vector_store %arg5[%c0_21, %c3, %c0_22, %c0_23], %31 {strides = array<i32>} : memref<1x8x16x16xf32, #tpu.memory_space<vmem>>, vector<1x1x16x16xf32>,
    %32 = vector.extract_strided_slice %6 {offsets = [4, 0, 0], sizes = [1, 4, 16], strides = [1, 1, 1]} : vector<8x4x16xf32> to vector<1x4x16xf32>
    %33 = vector.shape_cast %32 : vector<1x4x16xf32> to vector<4x16xf32>
    %cst_24 = arith.constant dense<0.000000e+00> : vector<16x16xf32>
    %34 = tpu.matmul %7, %33, %cst_24 {dimension_numbers = #tpu.dot_dimension_numbers<[1], [0], [0], [1], [0, 0, 1, 1], [], []>} : vector<16x4xf32>, vector<4x16xf32>, vector<16x16xf32> -> vector<16x16xf32>
    %c0_25 = arith.constant 0 : index
    %c4 = arith.constant 4 : index
    %c0_26 = arith.constant 0 : index
    %c0_27 = arith.constant 0 : index
    %35 = vector.load %arg5[%c0_25, %c4, %c0_26, %c0_27] : memref<1x8x16x16xf32, #tpu.memory_space<vmem>>, vector<1x1x16x16xf32>
    %36 = vector.shape_cast %35 : vector<1x1x16x16xf32> to vector<16x16xf32>
    %37 = vector.shape_cast %34 : vector<16x16xf32> to vector<1x1x16x16xf32>
    tpu.vector_store %arg5[%c0_25, %c4, %c0_26, %c0_27], %37 {strides = array<i32>} : memref<1x8x16x16xf32, #tpu.memory_space<vmem>>, vector<1x1x16x16xf32>,
    %38 = vector.extract_strided_slice %6 {offsets = [5, 0, 0], sizes = [1, 4, 16], strides = [1, 1, 1]} : vector<8x4x16xf32> to vector<1x4x16xf32>
    %39 = vector.shape_cast %38 : vector<1x4x16xf32> to vector<4x16xf32>
    %cst_28 = arith.constant dense<0.000000e+00> : vector<16x16xf32>
    %40 = tpu.matmul %7, %39, %cst_28 {dimension_numbers = #tpu.dot_dimension_numbers<[1], [0], [0], [1], [0, 0, 1, 1], [], []>} : vector<16x4xf32>, vector<4x16xf32>, vector<16x16xf32> -> vector<16x16xf32>
    %c0_29 = arith.constant 0 : index
    %c5 = arith.constant 5 : index
    %c0_30 = arith.constant 0 : index
    %c0_31 = arith.constant 0 : index
    %41 = vector.load %arg5[%c0_29, %c5, %c0_30, %c0_31] : memref<1x8x16x16xf32, #tpu.memory_space<vmem>>, vector<1x1x16x16xf32>
    %42 = vector.shape_cast %41 : vector<1x1x16x16xf32> to vector<16x16xf32>
    %43 = vector.shape_cast %40 : vector<16x16xf32> to vector<1x1x16x16xf32>
    tpu.vector_store %arg5[%c0_29, %c5, %c0_30, %c0_31], %43 {strides = array<i32>} : memref<1x8x16x16xf32, #tpu.memory_space<vmem>>, vector<1x1x16x16xf32>,
    %44 = vector.extract_strided_slice %6 {offsets = [6, 0, 0], sizes = [1, 4, 16], strides = [1, 1, 1]} : vector<8x4x16xf32> to vector<1x4x16xf32>
    %45 = vector.shape_cast %44 : vector<1x4x16xf32> to vector<4x16xf32>
    %cst_32 = arith.constant dense<0.000000e+00> : vector<16x16xf32>
    %46 = tpu.matmul %7, %45, %cst_32 {dimension_numbers = #tpu.dot_dimension_numbers<[1], [0], [0], [1], [0, 0, 1, 1], [], []>} : vector<16x4xf32>, vector<4x16xf32>, vector<16x16xf32> -> vector<16x16xf32>
    %c0_33 = arith.constant 0 : index
    %c6 = arith.constant 6 : index
    %c0_34 = arith.constant 0 : index
    %c0_35 = arith.constant 0 : index
    %47 = vector.load %arg5[%c0_33, %c6, %c0_34, %c0_35] : memref<1x8x16x16xf32, #tpu.memory_space<vmem>>, vector<1x1x16x16xf32>
    %48 = vector.shape_cast %47 : vector<1x1x16x16xf32> to vector<16x16xf32>
    %49 = vector.shape_cast %46 : vector<16x16xf32> to vector<1x1x16x16xf32>
    tpu.vector_store %arg5[%c0_33, %c6, %c0_34, %c0_35], %49 {strides = array<i32>} : memref<1x8x16x16xf32, #tpu.memory_space<vmem>>, vector<1x1x16x16xf32>,
    %50 = vector.extract_strided_slice %6 {offsets = [7, 0, 0], sizes = [1, 4, 16], strides = [1, 1, 1]} : vector<8x4x16xf32> to vector<1x4x16xf32>
    %51 = vector.shape_cast %50 : vector<1x4x16xf32> to vector<4x16xf32>
    %cst_36 = arith.constant dense<0.000000e+00> : vector<16x16xf32>
    %52 = tpu.matmul %7, %51, %cst_36 {dimension_numbers = #tpu.dot_dimension_numbers<[1], [0], [0], [1], [0, 0, 1, 1], [], []>} : vector<16x4xf32>, vector<4x16xf32>, vector<16x16xf32> -> vector<16x16xf32>
    %c0_37 = arith.constant 0 : index
    %c7 = arith.constant 7 : index
    %c0_38 = arith.constant 0 : index
    %c0_39 = arith.constant 0 : index
    %53 = vector.load %arg5[%c0_37, %c7, %c0_38, %c0_39] : memref<1x8x16x16xf32, #tpu.memory_space<vmem>>, vector<1x1x16x16xf32>
    %54 = vector.shape_cast %53 : vector<1x1x16x16xf32> to vector<16x16xf32>
    %55 = vector.shape_cast %52 : vector<16x16xf32> to vector<1x1x16x16xf32>
    tpu.vector_store %arg5[%c0_37, %c7, %c0_38, %c0_39], %55 {strides = array<i32>} : memref<1x8x16x16xf32, #tpu.memory_space<vmem>>, vector<1x1x16x16xf32>,
    return
  }
  func.func @transform_0(%arg0: i32, %arg1: i32) -> (i32, i32, i32, i32) {
    %c0_i32 = arith.constant 0 : i32
    %c0_i32_0 = arith.constant 0 : i32
    %c0_i32_1 = arith.constant 0 : i32
    return %arg0, %arg1, %c0_i32, %c0_i32_0 : i32, i32, i32, i32
  }
  func.func @transform_1(%arg0: i32, %arg1: i32) -> (i32, i32) {
    %c0_i32 = arith.constant 0 : i32
    %c0_i32_0 = arith.constant 0 : i32
    %c0_i32_1 = arith.constant 0 : i32
    return %c0_i32, %c0_i32_0 : i32, i32
  }
  func.func @transform_2(%arg0: i32, %arg1: i32) -> (i32, i32) {
    %c0_i32 = arith.constant 0 : i32
    %c0_i32_0 = arith.constant 0 : i32
    %c0_i32_1 = arith.constant 0 : i32
    return %c0_i32, %c0_i32_0 : i32, i32
  }
  func.func @transform_3(%arg0: i32, %arg1: i32) -> (i32, i32, i32, i32) {
    %c0_i32 = arith.constant 0 : i32
    %c0_i32_0 = arith.constant 0 : i32
    %c0_i32_1 = arith.constant 0 : i32
    return %arg0, %arg1, %c0_i32, %c0_i32_0 : i32, i32, i32, i32
  }
}

</mosaic_0001>

<bundles_post_ra>
// kernel: _lambda_.11
= control target key start
LH: loop header
LB: loop body
LE: loop exit
PB: predicated region body
PF: predicated region fallthrough
CT: control target
= control target key end

     0   :  { %vm19_vm0 = vcmask 261120   ;;  %v224_v1 = vmov 0.0   ;;  %vm74_vm1 = vcmask 523264   ;;  %vm173_vm2 = vcmask 257024   ;;  %s286_s1 = inlined_call_operand.vmem [shape: bf16[64,32], index: 1, kind: input, shape index: {}]   ;;  %s287_s0 = inlined_call_operand.vmem [shape: bf16[32,64], index: 0, kind: input, shape index: {}]   ;;  %s288_s2 = inlined_call_operand.vmem [shape: f32[1,32], index: 2, kind: input, shape index: {}]   ;;  %s289_s3 = inlined_call_operand.vmem [shape: bf16[32,32], index: 3, kind: output, shape index: {}]  }
   0x1   :  { %v218_v0 = vld [vmem:[%s286_s1 + $0x18] sm:$0xff]   ;;  %22 = vst.msk [vmem:[#allocation2 + $0x10] sm:$0xff] %vm19_vm0, %v224_v1  ;;  %20 = vst.msk [vmem:[#allocation2] sm:$0xff] %vm19_vm0, %v224_v1  ;;  %v219_v2 = vld [vmem:[%s286_s1 + $0x10] sm:$0xff]  }
   0x2   :  { %21 = vst.msk [vmem:[#allocation2 + $0x8] sm:$0xff] %vm19_vm0, %v224_v1  ;;  %23 = vst.msk [vmem:[#allocation2 + $0x18] sm:$0xff] %vm19_vm0, %v224_v1  ;;  %205 = vmatprep.subr.bf16.mxu0 %v218_v0  ;;  %v220_v3 = vld [vmem:[%s286_s1 + $0x8] sm:$0xff]   ;;  %v222_v4 = vld [vmem:[%s287_s0] sm:$0xff]  }
   0x3   :  { %206 = vmatpush3.bf16.msra.mxu0 %v218_v0  ;;  %213 = vmatprep.mubr.msk.bf16.mxu0 %vm74_vm1, %v222_v4  ;;  %v221_v5 = vld [vmem:[%s286_s1] sm:$0xff]   ;;  %v223_v6 = vld [vmem:[%s287_s0 + $0x8] sm:$0xff]  }
   0x4   :  { %207 = vmatprep.subr.bf16.mxu0 %v219_v2  ;;  %v190_v19 = vld [vmem:[%s288_s2] ss:$0 sm:$0xff] }
   0x7   :  { %208 = vmatpush3.bf16.msra.mxu0 %v219_v2 }
   0x8   :  { %209 = vmatprep.subr.bf16.mxu0 %v220_v3  ;;  %v26_v7 = vld [vmem:[#allocation2 + $0x10] sm:$0xff]  ;;  %v24_v9 = vld [vmem:[#allocation2] sm:$0xff] }
   0x9   :  { %v27_v12 = vld [vmem:[#allocation2 + $0x18] sm:$0xff]  ;;  %v25_v15 = vld [vmem:[#allocation2 + $0x8] sm:$0xff] }
   0xb   :  { %210 = vmatpush3.bf16.msra.mxu0 %v220_v3 }
   0xc   :  { %211 = vmatprep.subr.bf16.mxu0 %v221_v5 }
   0xf   :  { %212 = vmatpush3.bf16.msra.mxu0 %v221_v5 }
  0x12   :  { %214 = vmatmul.mubr.msk.bf16.vlgmr.msra.gmra.mxu0 %vm74_vm1, %v223_v6 }
  0xd2   :  { %v215_v8 = vpop.f32.mrf.mxu0 }
  0xd3   :  { %v132_v10 = vadd.f32 %v215_v8, %v26_v7 }
  0xd4   :  { %v115_v11 = vpop.f32.mrf.mxu0 }
  0xd5   :  { %137 = vst.msk [vmem:[#allocation2 + $0x10] sm:$0xff] %vm19_vm0, %v132_v10  ;;  %v130_v13 = vadd.f32 %v115_v11, %v24_v9 }
  0xd6   :  { %v216_v14 = vpop.f32.mrf.mxu0 }
  0xd7   :  { %135 = vst.msk [vmem:[#allocation2] sm:$0xff] %vm19_vm0, %v130_v13  ;;  %v133_v16 = vadd.f32 %v216_v14, %v27_v12 }
  0xd8   :  { %v118_v17 = vpop.f32.mrf.mxu0 }
  0xd9   :  { %138 = vst.msk [vmem:[#allocation2 + $0x18] sm:$0xff] %vm19_vm0, %v133_v16  ;;  %v131_v18 = vadd.f32 %v118_v17, %v25_v15 }
  0xdb   :  { %136 = vst.msk [vmem:[#allocation2 + $0x8] sm:$0xff] %vm19_vm0, %v131_v18 }
  0xdc   :  { %v144_v20 = vld [vmem:[#allocation2 + $0x10] sm:$0xff] }
  0xdd   :  { %v155_v21 = vadd.f32 %v190_v19, %v144_v20 }
  0xde   :  { %v142_v22 = vld [vmem:[#allocation2] sm:$0xff] }
  0xdf   :  { %v197_v23 = vpack.c.bf16 %v155_v21, %v155_v21  ;;  %v153_v24 = vadd.f32 %v190_v19, %v142_v22 }
  0xe0   :  { %v145_v25 = vld [vmem:[#allocation2 + $0x18] sm:$0xff] }
  0xe1   :  { %176 = vst.msk [vmem:[%s289_s3 + $0x8] sm:$0xf] %vm173_vm2, %v197_v23  ;;  %v195_v26 = vpack.c.bf16 %v153_v24, %v153_v24  ;;  %v156_v27 = vadd.f32 %v190_v19, %v145_v25 }
  0xe2   :  { %v143_v28 = vld [vmem:[#allocation2 + $0x8] sm:$0xff] }
  0xe3   :  { %174 = vst.msk [vmem:[%s289_s3] sm:$0xf] %vm173_vm2, %v195_v26  ;;  %v198_v29 = vpack.c.bf16 %v156_v27, %v156_v27  ;;  %v154_v30 = vadd.f32 %v190_v19, %v143_v28 }
  0xe5   :  { %177 = vst.msk [vmem:[%s289_s3 + $0xc] sm:$0xf] %vm173_vm2, %v198_v29  ;;  %v196_v31 = vpack.c.bf16 %v154_v30, %v154_v30 }
  0xe7   :  { %175 = vst.msk [vmem:[%s289_s3 + $0x4] sm:$0xf] %vm173_vm2, %v196_v31 }

// kernel: _lambda_.12
= control target key start
LH: loop header
LB: loop body
LE: loop exit
PB: predicated region body
PF: predicated region fallthrough
CT: control target
= control target key end

     0   :  { %vm31_vm0 = vcmask 261120   ;;  %vm44_vm1 = vcmask 254976   ;;  %v312_v38 = vmov 0.0   ;;  %vm313_vm2 = vmmov 0   ;;  %s418_s0 = inlined_call_operand.vmem [shape: bf16[34,32], index: 0, kind: input, shape index: {}]   ;;  %s419_s3 = inlined_call_operand.vmem [shape: bf16[32,96], index: 3, kind: input, shape index: {}]   ;;  %s420_s1 = inlined_call_operand.vmem [shape: f32[1,32], index: 1, kind: input, shape index: {}]   ;;  %s421_s2 = inlined_call_operand.vmem [shape: f32[1,32], index: 2, kind: input, shape index: {}]   ;;  %s422_s4 = inlined_call_operand.vmem [shape: f32[1,96], index: 4, kind: input, shape index: {}]   ;;  %s423_s5 = inlined_call_operand.vmem [shape: bf16[34,96], index: 5, kind: output, shape index: {}]  }
   0x1   :  { %v272_v0 = vld [vmem:[%s418_s0 + $0x8] sm:$0xff]   ;;  %v265_v1 = vld [vmem:[%s418_s0] sm:$0xff]   ;;  %v25_v5 = vld [vmem:[%s418_s0 + $0x10] sm:$0x1]  ;;  %294 = vmatprep.subr.bf16.mxu1 %v312_v38  ;;  %278 = vmatprep.subr.bf16.mxu0 %v312_v38  ;;  %vm235_vm3 = vcmask 781312   ;;  %vm240_vm4 = vcmask 778240  }
   0x2   :  { %v270_v2 = vunpack.c.l.bf16 %v272_v0  ;;  %v271_v3 = vunpack.c.h.bf16 %v272_v0  ;;  %v266_v4 = vunpack.c.l.bf16 %v265_v1  ;;  %v267_v6 = vunpack.c.h.bf16 %v265_v1  ;;  %v300_v39 = vld [vmem:[%s419_s3 + $0x8] sm:$0xff]   ;;  %286 = vmatprep.mubr.msk.bf16.mxu1 %vm313_vm2, %v312_v38  ;;  %282 = vmatprep.mubr.msk.bf16.mxu0 %vm313_vm2, %v312_v38  ;;  %v301_v40 = vld [vmem:[%s419_s3] sm:$0xff]  }
   0x3   :  { %v30_v10 = vunpack.c.l.bf16 %v25_v5  ;;  %296 = vmatpush3.bf16.msra.mxu1 %v300_v39  ;;  %279 = vmatpush3.bf16.msra.mxu0 %v300_v39  ;;  %v246_v58 = vld [vmem:[%s420_s1] ss:$0 sm:$0xff] }
   0x4   :  { %v38_v7 = vsel %vm31_vm0, %v270_v2, 0.0  ;;  %v32_v8 = vsel %vm31_vm0, %v266_v4, 0.0  ;;  %v41_v9 = vsel %vm31_vm0, %v271_v3, 0.0  ;;  %v35_v11 = vsel %vm31_vm0, %v267_v6, 0.0  ;;  %295 = vmatprep.subr.bf16.mxu1 %v312_v38  ;;  %280 = vmatprep.subr.bf16.mxu0 %v312_v38  ;;  %v247_v63 = vld [vmem:[%s421_s2] ss:$0 sm:$0xff] }
   0x5   :  { %39 = vadd.xlane.f32.xlu0 %v38_v7  ;;  %33 = vadd.xlane.f32.xlu1 %v32_v8  ;;  %v45_v12 = vsel %vm44_vm1, %v30_v10, 0.0 }
   0x7   :  { %297 = vmatpush3.bf16.msra.mxu1 %v301_v40  ;;  %281 = vmatpush3.bf16.msra.mxu0 %v301_v40 }
   0x9   :  { %42 = vadd.xlane.f32.xlu0 %v41_v9  ;;  %36 = vadd.xlane.f32.xlu1 %v35_v11 }
   0xd   :  { %46 = vadd.xlane.f32.xlu0 %v45_v12 }
  0x8e   :  { %v40_v13 = vpop.xlane.xlu0 %39  ;;  %v34_v14 = vpop.xlane.xlu1 %33 }
  0x8f   :  { %v51_v15 = vmul.f32 0.03125, %v40_v13  ;;  %v49_v16 = vmul.f32 0.03125, %v34_v14 }
  0x91   :  { %v358_v17 = vsub.f32 %v270_v2, %v51_v15  ;;  %v360_v18 = vsub.f32 %v266_v4, %v49_v16 }
  0x92   :  { %v43_v19 = vpop.xlane.xlu0 %42  ;;  %v37_v20 = vpop.xlane.xlu1 %36 }
  0x93   :  { %v52_v21 = vmul.f32 0.03125, %v43_v19  ;;  %v61_v22 = vmul.f32 %v358_v17, %v358_v17  ;;  %v50_v23 = vmul.f32 0.03125, %v37_v20  ;;  %v59_v24 = vmul.f32 %v360_v18, %v360_v18 }
  0x95   :  { %v57_v25 = vsub.f32 %v271_v3, %v52_v21  ;;  %v70_v26 = vsel %vm31_vm0, %v61_v22, 0.0  ;;  %v367_v27 = vsub.f32 %v267_v6, %v50_v23  ;;  %v64_v31 = vsel %vm31_vm0, %v59_v24, 0.0 }
  0x96   :  { %v47_v28 = vpop.xlane.xlu0 %46  ;;  %71 = vadd.xlane.f32.xlu1 %v70_v26 }
  0x97   :  { %v53_v29 = vmul.f32 0.03125, %v47_v28  ;;  %v62_v30 = vmul.f32 %v57_v25, %v57_v25  ;;  %v60_v32 = vmul.f32 %v367_v27, %v367_v27 }
  0x99   :  { %v58_v33 = vsub.f32 %v30_v10, %v53_v29  ;;  %v73_v34 = vsel %vm31_vm0, %v62_v30, 0.0  ;;  %v67_v36 = vsel %vm31_vm0, %v60_v32, 0.0 }
  0x9a   :  { %74 = vadd.xlane.f32.xlu0 %v73_v34  ;;  %65 = vadd.xlane.f32.xlu1 %v64_v31 }
  0x9b   :  { %v63_v35 = vmul.f32 %v58_v33, %v58_v33 }
  0x9d   :  { %v76_v37 = vsel %vm44_vm1, %v63_v35, 0.0 }
  0x9e   :  { %77 = vadd.xlane.f32.xlu1 %v76_v37  ;;  %68 = vadd.xlane.f32.xlu0 %v67_v36 }
 0x11f   :  { %v72_v41 = vpop.xlane.xlu1 %71 }
 0x120   :  { %v81_v42 = vmul.f32 0.03125, %v72_v41 }
 0x122   :  { %v86_v43 = vadd.f32 1e-12, %v81_v42 }
 0x123   :  { %v75_v44 = vpop.xlane.xlu0 %74  ;;  %v66_v45 = vpop.xlane.xlu1 %65 }
 0x124   :  { %302 = vrsqrt.f32 %v86_v43  ;;  %v82_v46 = vmul.f32 0.03125, %v75_v44  ;;  %v79_v47 = vmul.f32 0.03125, %v66_v45 }
 0x126   :  { %v87_v48 = vadd.f32 1e-12, %v82_v46  ;;  %v84_v49 = vadd.f32 1e-12, %v79_v47 }
 0x127   :  { %v69_v50 = vpop.xlane.xlu0 %68  ;;  %v78_v51 = vpop.xlane.xlu1 %77 }
 0x128   :  { %304 = vrsqrt.f32 %v87_v48  ;;  %v80_v52 = vmul.f32 0.03125, %v69_v50  ;;  %v83_v53 = vmul.f32 0.03125, %v78_v51 }
 0x129   :  { %306 = vrsqrt.f32 %v84_v49 }
 0x12a   :  { %v85_v54 = vadd.f32 1e-12, %v80_v52  ;;  %v88_v55 = vadd.f32 1e-12, %v83_v53 }
 0x12c   :  { %308 = vrsqrt.f32 %v85_v54 }
 0x12d   :  { %310 = vrsqrt.f32 %v88_v55 }
 0x131   :  { %v303_v56 = vpop.eup %302 }
 0x132   :  { %v96_v57 = vmul.f32 %v303_v56, %v358_v17  ;;  %v248_v17 = vld [vmem:[%s422_s4] ss:$0 sm:$0xff] }
 0x134   :  { %v108_v62 = vmul.f32 %v246_v58, %v96_v57 }
 0x135   :  { %v305_v59 = vpop.eup %304 }
 0x136   :  { %v307_v60 = vpop.eup %306  ;;  %v97_v61 = vmul.f32 %v305_v59, %v57_v25  ;;  %v120_v4 = vadd.f32 %v247_v63, %v108_v62 }
 0x137   :  { %v94_v0 = vmul.f32 %v307_v60, %v360_v18 }
 0x138   :  { %v109_v1 = vmul.f32 %v246_v58, %v97_v61 }
 0x139   :  { %v309_v2 = vpop.eup %308  ;;  %v106_v7 = vmul.f32 %v246_v58, %v94_v0 }
 0x13a   :  { %v311_v3 = vpop.eup %310  ;;  %v121_v5 = vadd.f32 %v247_v63, %v109_v1  ;;  %v95_v6 = vmul.f32 %v309_v2, %v367_v27 }
 0x13b   :  { %v98_v8 = vmul.f32 %v311_v3, %v58_v33  ;;  %v118_v12 = vadd.f32 %v247_v63, %v106_v7 }
 0x13c   :  { %v124_v9 = vpack.c.bf16 %v121_v5, %v120_v4  ;;  %v107_v10 = vmul.f32 %v246_v58, %v95_v6 }
 0x13d   :  { %v110_v11 = vmul.f32 %v246_v58, %v98_v8 }
 0x13e   :  { %287 = vmatmul.mubr.msk.bf16.vlgmr.msra.gmra.mxu1 %vm31_vm0, %v124_v9  ;;  %v119_v13 = vadd.f32 %v247_v63, %v107_v10 }
 0x13f   :  { %290 = vmatprep.mubr.msk.bf16.mxu1 %vm313_vm2, %v312_v38  ;;  %v122_v15 = vadd.f32 %v247_v63, %v110_v11 }
 0x140   :  { %v123_v14 = vpack.c.bf16 %v119_v13, %v118_v12 }
 0x141   :  { %v125_v16 = vpack.c.bf16 %v122_v15, %v122_v15 }
 0x142   :  { %283 = vmatmul.mubr.msk.bf16.vlgmr.msra.gmra.mxu0 %vm31_vm0, %v123_v14 }
 0x146   :  { %291 = vmatmul.mubr.msk.bf16.gmra.mxu1 %vm31_vm0, %v125_v16 }
 0x1fe   :  { %v200_v18 = vpop.f32.mrf.mxu1 }
 0x1ff   :  { %v201_v19 = vadd.f32 %v248_v17, %v200_v18 }
 0x200   :  { %v288_v20 = vpop.f32.mrf.mxu1 }
 0x201   :  { %v261_v21 = vpack.c.bf16 %v201_v19, %v201_v19 }
 0x202   :  { %v192_v22 = vpop.f32.mrf.mxu0  ;;  %v203_v23 = vpop.f32.mrf.mxu1 }
 0x203   :  { %238 = vst.msk [vmem:[%s423_s5 + $0x8] sm:$0xf] %vm235_vm3, %v261_v21  ;;  %v193_v24 = vadd.f32 %v248_v17, %v192_v22  ;;  %v204_v25 = vadd.f32 %v248_v17, %v203_v23 }
 0x204   :  { %v284_v26 = vpop.f32.mrf.mxu0  ;;  %v289_v27 = vpop.f32.mrf.mxu1 }
 0x205   :  { %v259_v28 = vpack.c.bf16 %v193_v24, %v193_v24  ;;  %v262_v29 = vpack.c.bf16 %v204_v25, %v204_v25 }
 0x206   :  { %v195_v30 = vpop.f32.mrf.mxu0  ;;  %v208_v31 = vpop.f32.mrf.mxu1 }
 0x207   :  { %236 = vst.msk [vmem:[%s423_s5] sm:$0xf] %vm235_vm3, %v259_v28  ;;  %239 = vst.msk [vmem:[%s423_s5 + $0xc] sm:$0xf] %vm235_vm3, %v262_v29  ;;  %v196_v32 = vadd.f32 %v248_v17, %v195_v30  ;;  %v209_v33 = vadd.f32 %v248_v17, %v208_v31 }
 0x208   :  { %v285_v34 = vpop.f32.mrf.mxu0  ;;  %v292_v35 = vpop.f32.mrf.mxu1 }
 0x209   :  { %v260_v36 = vpack.c.bf16 %v196_v32, %v196_v32  ;;  %v263_v37 = vpack.c.bf16 %v209_v33, %v209_v33 }
 0x20a   :  { %v211_v38 = vpop.f32.mrf.mxu1 }
 0x20b   :  { %237 = vst.msk [vmem:[%s423_s5 + $0x4] sm:$0xf] %vm235_vm3, %v260_v36 }
 0x20c   :  { %241 = vst.msk [vmem:[%s423_s5 + $0x10] sm:$0x1] %vm240_vm4, %v263_v37  ;;  %v293_v39 = vpop.f32.mrf.mxu1 }

// kernel: _lambda_.13
= control target key start
LH: loop header
LB: loop body
LE: loop exit
PB: predicated region body
PF: predicated region fallthrough
CT: control target
= control target key end

     0   :  { %s1419_s12 = smov 0   ;;  %s1632_s0 = inlined_call_operand.vmem [shape: bf16[2,4,17,8], index: 0, kind: input, shape index: {}]   ;;  %s1633_s1 = inlined_call_operand.vmem [shape: bf16[2,4,17,8], index: 1, kind: input, shape index: {}]   ;;  %s1634_s2 = inlined_call_operand.vmem [shape: bf16[2,4,17,8], index: 2, kind: input, shape index: {}]   ;;  %s1635_s3 = inlined_call_operand.vmem [shape: bf16[2,4,17,8], index: 3, kind: output, shape index: {}]  }
   0x1 LB: > { %s1129_s13 = sadd.s32 4294967295, %s1396_s12   ;;  %p1133_p0 = scmp.ge.s32.totalorder %s1396_s12, 1  ;;  %s1396_s12 = sphi %s1419_s12, %s13_s12  }
   0x2   : > { %p157_p1 = scmp.lt.s32.totalorder %s1396_s12, 3 }
   0x4   : > { %p158_p2 = pnand %p1133_p0, %p157_p1 }
   0x5   : > { %p191_p3 = scmp.lt.s32.totalorder (!%p158_p2), %s1129_s13, 1 }
   0x6   : > { %161 = sbr.rel (%p158_p2) target bundleno = 774 (0x306), region = 32 }
   0xb   : > { %s1639_s13 = smov (!%p191_p3, %s1129_s13), 1  ;;  %vm264_vm0 = vcmask 64512   ;;  %vm572_vm1 = vcmask 131072   ;;  %vm565_vm2 = vcmask 138240   ;;  %vm722_vm3 = vcmask 1040384  }
   0xc   : > { %s1427_s14 = smul.u32 48, %s1639_s13  ;;  %vm1029_vm4 = vcmask 57344   ;;  %vm1030_vm5 = vsmask.f32 256  ;;  %vm1026_vm7 = vcmask 60416  }
   0xd   : > { %vm1593_vm6 = vmand %vm1029_vm4, %vm1030_vm5 }
   0xe   : > { %s1433_s17 = scalar_lea.vmem %s1633_s1, %s1427_s14  ;;  %s1443_s20 = scalar_lea.vmem %s1632_s0, %s1427_s14 }
   0xf   : > { %v1318_v0 = vld [vmem:[%s1433_s17 + $0x8] ss:$0 sps:$4 sm:$0x11]   ;;  %v1320_v1 = vld [vmem:[%s1433_s17] sm:$0xff]   ;;  %v1321_v3 = vld [vmem:[%s1433_s17 + $0xc] sm:$0xff]   ;;  %s1551_s23 = scalar_lea.vmem %s1634_s2, %s1427_s14  ;;  %s1591_s26 = scalar_lea.vmem %s1635_s3, %s1427_s14 }
  0x10   : > { %v1319_v2 = vld [vmem:[%s1433_s17 + $0x14] ss:$0 sps:$4 sm:$0x11]   ;;  %1300 = vmatprep.subr.msk.bf16.mxu0 %vm264_vm0, %v1318_v0  ;;  %v275_v4 = vsel %vm264_vm0, %v1318_v0, 0  ;;  %v1322_v6 = vld [vmem:[%s1443_s20] sm:$0xff]   ;;  %v1323_v7 = vld [vmem:[%s1443_s20 + $0xc] sm:$0xff]  }
  0x11   : > { %1302 = vmatprep.subr.msk.bf16.mxu1 %vm264_vm0, %v1319_v2  ;;  %1237 = vmatpush3.bf16.xpose.msra.mxu0 %v275_v4  ;;  %v351_v5 = vsel %vm264_vm0, %v1319_v2, 0  ;;  %v272_v8 = vsel %vm264_vm0, %v1320_v1, 0  ;;  %v1326_v9 = vld [vmem:[%s1433_s17 + $0x20] ss:$0 sps:$4 sm:$0x11]   ;;  %v348_v10 = vsel %vm264_vm0, %v1321_v3, 0 }
  0x12   : > { %1245 = vmatpush3.bf16.xpose.msra.mxu1 %v351_v5  ;;  %1301 = vmatprep.subr.msk.bf16.mxu0 %vm264_vm0, %v1320_v1  ;;  %v1327_v11 = vld [vmem:[%s1433_s17 + $0x2c] ss:$0 sps:$4 sm:$0x11]   ;;  %v1324_v12 = vld [vmem:[%s1443_s20 + $0x8] ss:$0 sps:$4 sm:$0x11]  }
  0x13   : > { %1303 = vmatprep.subr.msk.bf16.mxu1 %vm264_vm0, %v1321_v3  ;;  %1240 = vmatprep.mubr.msk.bf16.mxu0 %vm264_vm0, %v1322_v6  ;;  %v1325_v13 = vld [vmem:[%s1443_s20 + $0x14] ss:$0 sps:$4 sm:$0x11]   ;;  %v427_v14 = vsel %vm264_vm0, %v1326_v9, 0  ;;  %v1328_v15 = vld [vmem:[%s1433_s17 + $0x18] sm:$0xff]   ;;  %v503_v16 = vsel %vm264_vm0, %v1327_v11, 0 }
  0x14   : > { %1248 = vmatprep.mubr.msk.bf16.mxu1 %vm264_vm0, %v1323_v7  ;;  %v1329_v17 = vld [vmem:[%s1433_s17 + $0x24] sm:$0xff]   ;;  %v1330_v18 = vld [vmem:[%s1443_s20 + $0x18] sm:$0xff]   ;;  %v424_v20 = vsel %vm264_vm0, %v1328_v15, 0  ;;  %v1332_v22 = vld [vmem:[%s1443_s20 + $0x20] ss:$0 sps:$4 sm:$0x11]  }
  0x15   : > { %v1331_v19 = vld [vmem:[%s1443_s20 + $0x24] sm:$0xff]   ;;  %v500_v21 = vsel %vm264_vm0, %v1329_v17, 0  ;;  %v1333_v23 = vld [vmem:[%s1443_s20 + $0x2c] ss:$0 sps:$4 sm:$0x11]  }
  0x19   : > { %1239 = vmatpush3.bf16.xpose.msra.mxu0 %v272_v8 }
  0x1a   : > { %1247 = vmatpush3.bf16.xpose.msra.mxu1 %v348_v10  ;;  %1304 = vmatprep.subr.msk.bf16.mxu0 %vm264_vm0, %v1326_v9 }
  0x1b   : > { %1306 = vmatprep.subr.msk.bf16.mxu1 %vm264_vm0, %v1327_v11 }
  0x20   : > { %1241 = vmatmul.mubr.msk.bf16.vlgmr.msra.gmra.mxu0 %vm264_vm0, %v1324_v12 }
  0x21   : > { %1249 = vmatmul.mubr.msk.bf16.vlgmr.msra.gmra.mxu1 %vm264_vm0, %v1325_v13  ;;  %1253 = vmatpush3.bf16.xpose.msra.mxu0 %v427_v14 }
  0x22   : > { %1261 = vmatpush3.bf16.xpose.msra.mxu1 %v503_v16  ;;  %1305 = vmatprep.subr.msk.bf16.mxu0 %vm264_vm0, %v1328_v15 }
  0x23   : > { %1307 = vmatprep.subr.msk.bf16.mxu1 %vm264_vm0, %v1329_v17  ;;  %1256 = vmatprep.mubr.msk.bf16.mxu0 %vm264_vm0, %v1330_v18 }
  0x24   : > { %1264 = vmatprep.mubr.msk.bf16.mxu1 %vm264_vm0, %v1331_v19 }
  0x29   : > { %1255 = vmatpush3.bf16.xpose.msra.mxu0 %v424_v20 }
  0x2a   : > { %1263 = vmatpush3.bf16.xpose.msra.mxu1 %v500_v21 }
  0x30   : > { %1257 = vmatmul.mubr.msk.bf16.vlgmr.msra.gmra.mxu0 %vm264_vm0, %v1332_v22 }
  0x31   : > { %1265 = vmatmul.mubr.msk.bf16.vlgmr.msra.gmra.mxu1 %vm264_vm0, %v1333_v23 }
  0xe0   : > { %v1242_v24 = vpop.f32.mrf.mxu0 }
  0xe1   : > { %v555_v25 = vmul.f32 0.35355338, %v1242_v24  ;;  %v1250_v26 = vpop.f32.mrf.mxu1 }
  0xe2   : > { %v558_v27 = vmul.f32 0.35355338, %v1250_v26  ;;  %v311_v28 = vpop.f32.mrf.mxu0 }
  0xe3   : > { %v553_v29 = vmul.f32 0.35355338, %v311_v28  ;;  %v387_v30 = vpop.f32.mrf.mxu1  ;;  %v573_v31 = vsel %vm572_vm1, %v555_v25, -inf }
  0xe4   : > { %v556_v32 = vmul.f32 0.35355338, %v387_v30  ;;  %v582_v33 = vsel %vm572_vm1, %v558_v27, -inf  ;;  %574 = vmax.xlane.f32.xlu0 %v573_v31  ;;  %v1243_v34 = vpop.f32.mrf.mxu0 }
  0xe5   : > { %583 = vmax.xlane.f32.xlu1 %v582_v33  ;;  %v1251_v35 = vpop.f32.mrf.mxu1  ;;  %v566_v40 = vsel %vm565_vm2, %v553_v29, -inf }
  0xe6   : > { %v314_v36 = vpop.f32.mrf.mxu0  ;;  %v576_v37 = vsel %vm565_vm2, %v556_v32, -inf }
  0xe7   : > { %v554_v38 = vmul.f32 0.35355338, %v314_v36  ;;  %v390_v39 = vpop.f32.mrf.mxu1 }
  0xe8   : > { %v557_v41 = vmul.f32 0.35355338, %v390_v39  ;;  %567 = vmax.xlane.f32.xlu0 %v566_v40 }
  0xe9   : > { %577 = vmax.xlane.f32.xlu1 %v576_v37  ;;  %v569_v42 = vsel %vm565_vm2, %v554_v38, -inf }
  0xea   : > { %v579_v43 = vsel %vm565_vm2, %v557_v41, -inf }
  0xec   : > { %570 = vmax.xlane.f32.xlu0 %v569_v42 }
  0xed   : > { %580 = vmax.xlane.f32.xlu1 %v579_v43 }
  0xf0   : > { %v1258_v44 = vpop.f32.mrf.mxu0 }
  0xf1   : > { %v1266_v45 = vpop.f32.mrf.mxu1  ;;  %v1488_v56 = vmul.f32 0.35355338, %v1258_v44 }
  0xf2   : > { %v463_v46 = vpop.f32.mrf.mxu0  ;;  %v1494_v60 = vmul.f32 0.35355338, %v1266_v45 }
  0xf3   : > { %v559_v47 = vmul.f32 0.35355338, %v463_v46  ;;  %v539_v48 = vpop.f32.mrf.mxu1  ;;  %v591_v61 = vsel %vm572_vm1, %v1488_v56, -inf }
  0xf4   : > { %v1259_v49 = vpop.f32.mrf.mxu0  ;;  %v562_v50 = vmul.f32 0.35355338, %v539_v48  ;;  %v600_v63 = vsel %vm572_vm1, %v1494_v60, -inf }
  0xf5   : > { %v1267_v51 = vpop.f32.mrf.mxu1  ;;  %v585_v52 = vsel %vm565_vm2, %v559_v47, -inf }
  0xf6   : > { %586 = vmax.xlane.f32.xlu0 %v585_v52  ;;  %v466_v53 = vpop.f32.mrf.mxu0  ;;  %v594_v58 = vsel %vm565_vm2, %v562_v50, -inf }
  0xf7   : > { %v542_v54 = vpop.f32.mrf.mxu1  ;;  %v560_v55 = vmul.f32 0.35355338, %v466_v53 }
  0xf8   : > { %v1490_v57 = vmul.f32 0.35355338, %v542_v54 }
  0xf9   : > { %v588_v59 = vsel %vm565_vm2, %v560_v55, -inf }
  0xfa   : > { %595 = vmax.xlane.f32.xlu0 %v594_v58  ;;  %589 = vmax.xlane.f32.xlu1 %v588_v59  ;;  %v597_v62 = vsel %vm565_vm2, %v1490_v57, -inf  ;;  %v1334_v58 = vld [vmem:[%s1551_s23 + $0x8] ss:$0 sps:$4 sm:$0x11]  }
  0xfe   : > { %592 = vmax.xlane.f32.xlu0 %v591_v61  ;;  %598 = vmax.xlane.f32.xlu1 %v597_v62 }
 0x102   : > { %601 = vmax.xlane.f32.xlu1 %v600_v63 }
 0x16d   : > { %v575_v0 = vpop.xlane.xlu0 %574 }
 0x16e   : > { %v584_v1 = vpop.xlane.xlu1 %583  ;;  %v605_v2 = vsub.f32 %v555_v25, %v575_v0  ;;  %v1336_v0 = vld [vmem:[%s1551_s23 + $0x14] ss:$0 sps:$4 sm:$0x11]  }
 0x16f   : > { %v608_v3 = vsub.f32 %v558_v27, %v584_v1  ;;  %v1335_v1 = vld [vmem:[%s1551_s23] sm:$0xff]  }
 0x170   : > { %v619_v4 = vmul.f32 1.442695, %v605_v2 }
 0x171   : > { %v625_v5 = vmul.f32 1.442695, %v608_v3  ;;  %v568_v6 = vpop.xlane.xlu0 %567  ;;  %v1337_v3 = vld [vmem:[%s1551_s23 + $0xc] sm:$0xff]  }
 0x172   : > { %1342 = vpow2.f32 %v619_v4  ;;  %v578_v7 = vpop.xlane.xlu1 %577  ;;  %v603_v8 = vsub.f32 %v553_v29, %v568_v6  ;;  %v1338_v4 = vld [vmem:[%s1551_s23 + $0x20] ss:$0 sps:$4 sm:$0x11]  }
 0x173   : > { %1344 = vpow2.f32 %v625_v5  ;;  %v606_v9 = vsub.f32 %v556_v32, %v578_v7  ;;  %v1339_v5 = vld [vmem:[%s1551_s23 + $0x2c] ss:$0 sps:$4 sm:$0x11]  }
 0x174   : > { %v615_v10 = vmul.f32 1.442695, %v603_v8 }
 0x175   : > { %v621_v11 = vmul.f32 1.442695, %v606_v9  ;;  %v571_v12 = vpop.xlane.xlu0 %570 }
 0x176   : > { %1346 = vpow2.f32 %v615_v10  ;;  %v581_v13 = vpop.xlane.xlu1 %580  ;;  %v604_v14 = vsub.f32 %v554_v38, %v571_v12 }
 0x177   : > { %1348 = vpow2.f32 %v621_v11  ;;  %v607_v15 = vsub.f32 %v557_v41, %v581_v13 }
 0x178   : > { %v617_v16 = vmul.f32 1.442695, %v604_v14 }
 0x179   : > { %v623_v17 = vmul.f32 1.442695, %v607_v15 }
 0x17a   : > { %1350 = vpow2.f32 %v617_v16 }
 0x17b   : > { %1352 = vpow2.f32 %v623_v17 }
 0x17f   : > { %v1502_v18 = vpop.eup %1342  ;;  %v587_v19 = vpop.xlane.xlu0 %586 }
 0x180   : > { %v1504_v20 = vpop.eup %1344  ;;  %v609_v21 = vsub.f32 %v559_v47, %v587_v19  ;;  %v645_v22 = vsel %vm572_vm1, %v1502_v18, 0.0 }
 0x181   : > { %646 = vadd.xlane.f32.xlu0 %v645_v22  ;;  %v654_v23 = vsel %vm572_vm1, %v1504_v20, 0.0 }
 0x182   : > { %v627_v24 = vmul.f32 1.442695, %v609_v21  ;;  %655 = vadd.xlane.f32.xlu1 %v654_v23 }
 0x183   : > { %v1510_v25 = vpop.eup %1346  ;;  %v596_v26 = vpop.xlane.xlu0 %595 }
 0x184   : > { %v590_v27 = vpop.xlane.xlu1 %589  ;;  %v1512_v28 = vpop.eup %1348  ;;  %1354 = vpow2.f32 %v627_v24  ;;  %v612_v29 = vsub.f32 %v562_v50, %v596_v26  ;;  %v639_v31 = vsel %vm565_vm2, %v1510_v25, 0.0 }
 0x185   : > { %v610_v30 = vsub.f32 %v560_v55, %v590_v27  ;;  %640 = vadd.xlane.f32.xlu0 %v639_v31  ;;  %v648_v37 = vsel %vm565_vm2, %v1512_v28, 0.0 }
 0x186   : > { %v633_v32 = vmul.f32 1.442695, %v612_v29 }
 0x187   : > { %v629_v33 = vmul.f32 1.442695, %v610_v30  ;;  %v1516_v34 = vpop.eup %1350  ;;  %v593_v35 = vpop.xlane.xlu0 %592 }
 0x188   : > { %v599_v36 = vpop.xlane.xlu1 %598  ;;  %1356 = vpow2.f32 %v633_v32  ;;  %v611_v38 = vsub.f32 %v1488_v56, %v593_v35  ;;  %v642_v40 = vsel %vm565_vm2, %v1516_v34, 0.0  ;;  %v1524_v41 = vpop.eup %1352 }
 0x189   : > { %v613_v39 = vsub.f32 %v1490_v57, %v599_v36  ;;  %1358 = vpow2.f32 %v629_v33  ;;  %649 = vadd.xlane.f32.xlu0 %v648_v37  ;;  %643 = vadd.xlane.f32.xlu1 %v642_v40  ;;  %v651_v46 = vsel %vm565_vm2, %v1524_v41, 0.0  ;;  %v1340_v37 = vld [vmem:[%s1551_s23 + $0x18] sm:$0xff]  }
 0x18a   : > { %v631_v42 = vmul.f32 1.442695, %v611_v38  ;;  %v1341_v38 = vld [vmem:[%s1551_s23 + $0x24] sm:$0xff]  }
 0x18b   : > { %v635_v43 = vmul.f32 1.442695, %v613_v39 }
 0x18c   : > { %v602_v44 = vpop.xlane.xlu1 %601  ;;  %1360 = vpow2.f32 %v631_v42 }
 0x18d   : > { %v614_v45 = vsub.f32 %v1494_v60, %v602_v44  ;;  %1362 = vpow2.f32 %v635_v43  ;;  %652 = vadd.xlane.f32.xlu1 %v651_v46  ;;  %v1398_v60 = vmov 0  }
 0x18e   : > { %v724_v61 = vsel %vm722_vm3, 65535, %v1398_v60 }
 0x18f   : > { %v637_v47 = vmul.f32 1.442695, %v614_v45  ;;  %v726_v63 = vand.u32 %v1334_v58, %v724_v61  ;;  %v792_v2 = vand.u32 %v1336_v0, %v724_v61  ;;  %v858_v6 = vand.u32 %v1338_v4, %v724_v61 }
 0x190   : > { %v924_v7 = vand.u32 %v1339_v5, %v724_v61 }
 0x191   : > { %1364 = vpow2.f32 %v637_v47  ;;  %v1529_v48 = vpop.eup %1354  ;;  %1268 = vmatprep.subr.bf16.mxu0 %v726_v63  ;;  %1276 = vmatprep.subr.bf16.mxu1 %v792_v2 }
 0x192   : > { %v657_v49 = vsel %vm565_vm2, %v1529_v48, 0.0  ;;  %1269 = vmatpush3.bf16.msra.mxu0 %v726_v63  ;;  %1277 = vmatpush3.bf16.msra.mxu1 %v792_v2 }
 0x193   : > { %658 = vadd.xlane.f32.xlu0 %v657_v49  ;;  %1270 = vmatprep.subr.bf16.mxu0 %v1335_v1 }
 0x194   : > { %1278 = vmatprep.subr.bf16.mxu1 %v1337_v3 }
 0x195   : > { %v1533_v50 = vpop.eup %1356 }
 0x196   : > { %v1535_v51 = vpop.eup %1358  ;;  %v666_v52 = vsel %vm565_vm2, %v1533_v50, 0.0  ;;  %1271 = vmatpush3.bf16.msra.mxu0 %v1335_v1  ;;  %1279 = vmatpush3.bf16.msra.mxu1 %v1337_v3 }
 0x197   : > { %667 = vadd.xlane.f32.xlu0 %v666_v52  ;;  %v660_v53 = vsel %vm565_vm2, %v1535_v51, 0.0  ;;  %1284 = vmatprep.subr.bf16.mxu0 %v858_v6 }
 0x198   : > { %661 = vadd.xlane.f32.xlu1 %v660_v53  ;;  %1292 = vmatprep.subr.bf16.mxu1 %v924_v7 }
 0x199   : > { %v1541_v54 = vpop.eup %1360 }
 0x19a   : > { %v1543_v55 = vpop.eup %1362  ;;  %v663_v56 = vsel %vm572_vm1, %v1541_v54, 0.0 }
 0x19b   : > { %664 = vadd.xlane.f32.xlu0 %v663_v56  ;;  %v669_v57 = vsel %vm565_vm2, %v1543_v55, 0.0 }
 0x19c   : > { %670 = vadd.xlane.f32.xlu1 %v669_v57 }
 0x19e   : > { %v1556_v59 = vpop.eup %1364 }
 0x19f   : > { %v672_v62 = vsel %vm572_vm1, %v1556_v59, 0.0 }
 0x1a0   : > { %673 = vadd.xlane.f32.xlu1 %v672_v62  ;;  %v1037_v62 = vld [vmem:[%s1591_s26 + $0x14] sm:$0x1] }
 0x20a   : > { %v647_v8 = vpop.xlane.xlu0 %646 }
 0x20b   : > { %v656_v9 = vpop.xlane.xlu1 %655  ;;  %1366 = vrcp.f32 %v647_v8 }
 0x20e   : > { %v641_v10 = vpop.xlane.xlu0 %640 }
 0x20f   : > { %1368 = vrcp.f32 %v641_v10  ;;  %v1042_v10 = vld [vmem:[%s1591_s26 + $0x20] sm:$0x1] }
 0x210   : > { %1370 = vrcp.f32 %v656_v9 }
 0x212   : > { %v650_v11 = vpop.xlane.xlu0 %649  ;;  %v644_v12 = vpop.xlane.xlu1 %643 }
 0x213   : > { %1372 = vrcp.f32 %v644_v12 }
 0x214   : > { %1374 = vrcp.f32 %v650_v11 }
 0x216   : > { %v653_v13 = vpop.xlane.xlu1 %652 }
 0x217   : > { %1376 = vrcp.f32 %v653_v13 }
 0x218   : > { %v1367_v15 = vpop.eup %1366 }
 0x219   : > { %v689_v23 = vmul.f32 %v1367_v15, %v1502_v18 }
 0x21b   : > { %v700_v35 = vpack.c.bf16 %v689_v23, %v689_v23 }
 0x21c   : > { %v659_v14 = vpop.xlane.xlu0 %658  ;;  %v1369_v16 = vpop.eup %1368 }
 0x21d   : > { %v1371_v17 = vpop.eup %1370  ;;  %1378 = vrcp.f32 %v659_v14  ;;  %v687_v26 = vmul.f32 %v1369_v16, %v1510_v25 }
 0x21e   : > { %v692_v32 = vmul.f32 %v1371_v17, %v1504_v20  ;;  %v1047_v17 = vld [vmem:[%s1591_s26 + $0x2c] sm:$0x1] }
 0x220   : > { %v668_v19 = vpop.xlane.xlu0 %667  ;;  %v1373_v21 = vpop.eup %1372 }
 0x221   : > { %v662_v22 = vpop.xlane.xlu1 %661  ;;  %v1375_v24 = vpop.eup %1374  ;;  %v688_v27 = vmul.f32 %v1373_v21, %v1516_v34  ;;  %v702_v34 = vpack.c.bf16 %v692_v32, %v692_v32 }
 0x222   : > { %1380 = vrcp.f32 %v662_v22  ;;  %v690_v36 = vmul.f32 %v1375_v24, %v1512_v28 }
 0x223   : > { %1382 = vrcp.f32 %v668_v19  ;;  %v699_v31 = vpack.c.bf16 %v688_v27, %v687_v26 }
 0x224   : > { %v1377_v29 = vpop.eup %1376  ;;  %v665_v30 = vpop.xlane.xlu0 %664 }
 0x225   : > { %1384 = vrcp.f32 %v665_v30  ;;  %v671_v33 = vpop.xlane.xlu1 %670  ;;  %v691_v18 = vmul.f32 %v1377_v29, %v1524_v41  ;;  %1272 = vmatprep.mubr.msk.bf16.mxu0 %vm565_vm2, %v699_v31 }
 0x226   : > { %1386 = vrcp.f32 %v671_v33  ;;  %1273 = vmatmul.mubr.msk.bf16.vlgmr.msra.gmra.mxu0 %vm565_vm2, %v700_v35 }
 0x227   : > { %v701_v25 = vpack.c.bf16 %v691_v18, %v690_v36  ;;  %1285 = vmatpush3.bf16.msra.mxu0 %v858_v6 }
 0x228   : > { %1286 = vmatprep.subr.bf16.mxu0 %v1340_v37 }
 0x229   : > { %v674_v39 = vpop.xlane.xlu1 %673  ;;  %1280 = vmatprep.mubr.msk.bf16.mxu1 %vm565_vm2, %v701_v25 }
 0x22a   : > { %1388 = vrcp.f32 %v674_v39  ;;  %1281 = vmatmul.mubr.msk.bf16.vlgmr.msra.gmra.mxu1 %vm565_vm2, %v702_v34  ;;  %v1379_v20 = vpop.eup %1378 }
 0x22b   : > { %1293 = vmatpush3.bf16.msra.mxu1 %v924_v7  ;;  %1287 = vmatpush3.bf16.msra.mxu0 %v1340_v37  ;;  %v693_v40 = vmul.f32 %v1379_v20, %v1529_v48 }
 0x22c   : > { %1294 = vmatprep.subr.bf16.mxu1 %v1341_v38 }
 0x22f   : > { %v1381_v28 = vpop.eup %1380  ;;  %1295 = vmatpush3.bf16.msra.mxu1 %v1341_v38 }
 0x230   : > { %v694_v41 = vmul.f32 %v1381_v28, %v1535_v51  ;;  %v1383_v42 = vpop.eup %1382 }
 0x231   : > { %v696_v47 = vmul.f32 %v1383_v42, %v1533_v50 }
 0x232   : > { %v1385_v43 = vpop.eup %1384  ;;  %v703_v44 = vpack.c.bf16 %v694_v41, %v693_v40 }
 0x233   : > { %v1387_v45 = vpop.eup %1386  ;;  %v695_v46 = vmul.f32 %v1385_v43, %v1541_v54 }
 0x234   : > { %1288 = vmatprep.mubr.msk.bf16.mxu0 %vm565_vm2, %v703_v44  ;;  %v697_v49 = vmul.f32 %v1387_v45, %v1543_v55  ;;  %v1032_v55 = vld [vmem:[%s1591_s26 + $0x8] sm:$0x1] }
 0x235   : > { %v704_v52 = vpack.c.bf16 %v695_v46, %v695_v46 }
 0x236   : > { %v705_v53 = vpack.c.bf16 %v697_v49, %v696_v47 }
 0x237   : > { %v1389_v56 = vpop.eup %1388  ;;  %1289 = vmatmul.mubr.msk.bf16.vlgmr.msra.gmra.mxu0 %vm565_vm2, %v704_v52 }
 0x238   : > { %1296 = vmatprep.mubr.msk.bf16.mxu1 %vm565_vm2, %v705_v53  ;;  %v698_v48 = vmul.f32 %v1389_v56, %v1556_v59 }
 0x23a   : > { %v706_v51 = vpack.c.bf16 %v698_v48, %v698_v48 }
 0x23c   : > { %1297 = vmatmul.mubr.msk.bf16.vlgmr.msra.gmra.mxu1 %vm565_vm2, %v706_v51 }
 0x2e6   : > { %v1274_v50 = vpop.f32.mrf.mxu0 }
 0x2e7   : > { %v1194_v57 = vpack.c.bf16 %v1274_v50, %v1274_v50 }
 0x2e8   : > { %v762_v58 = vpop.f32.mrf.mxu0 }
 0x2e9   : > { %v1033_v59 = vsel %vm1593_vm6, %v1194_v57, %v1032_v55  ;;  %v1192_v60 = vpack.c.bf16 %v762_v58, %v762_v58 }
 0x2ea   : > { %v1282_v61 = vpop.f32.mrf.mxu1  ;;  %1034 = vst [vmem:[%s1591_s26 + $0x8] sm:$0x1] %v1033_v59  ;;  %v1275_v63 = vpop.f32.mrf.mxu0 }
 0x2eb   : > { %v1197_v0 = vpack.c.bf16 %v1282_v61, %v1282_v61  ;;  %1027 = vst.msk [vmem:[%s1591_s26] sm:$0xf] %vm1026_vm7, %v1192_v60 }
 0x2ec   : > { %v828_v1 = vpop.f32.mrf.mxu1  ;;  %v765_v3 = vpop.f32.mrf.mxu0 }
 0x2ed   : > { %v1038_v2 = vsel %vm1593_vm6, %v1197_v0, %v1037_v62  ;;  %v1195_v4 = vpack.c.bf16 %v828_v1, %v828_v1  ;;  %v1193_v5 = vpack.c.bf16 %v765_v3, %v765_v3 }
 0x2ee   : > { %1039 = vst [vmem:[%s1591_s26 + $0x14] sm:$0x1] %v1038_v2  ;;  %v1283_v6 = vpop.f32.mrf.mxu1 }
 0x2ef   : > { %1035 = vst.msk [vmem:[%s1591_s26 + $0xc] sm:$0xf] %vm1026_vm7, %v1195_v4  ;;  %1028 = vst.msk [vmem:[%s1591_s26 + $0x4] sm:$0xf] %vm1026_vm7, %v1193_v5 }
 0x2f0   : > { %v831_v7 = vpop.f32.mrf.mxu1 }
 0x2f1   : > { %v1196_v8 = vpack.c.bf16 %v831_v7, %v831_v7 }
 0x2f3   : > { %1036 = vst.msk [vmem:[%s1591_s26 + $0x10] sm:$0xf] %vm1026_vm7, %v1196_v8 }
 0x2f7   : > { %v1290_v9 = vpop.f32.mrf.mxu0 }
 0x2f8   : > { %v1200_v11 = vpack.c.bf16 %v1290_v9, %v1290_v9 }
 0x2f9   : > { %v894_v12 = vpop.f32.mrf.mxu0 }
 0x2fa   : > { %v1043_v13 = vsel %vm1593_vm6, %v1200_v11, %v1042_v10  ;;  %v1198_v14 = vpack.c.bf16 %v894_v12, %v894_v12 }
 0x2fb   : > { %1044 = vst [vmem:[%s1591_s26 + $0x20] sm:$0x1] %v1043_v13  ;;  %v1291_v15 = vpop.f32.mrf.mxu0 }
 0x2fc   : > { %1040 = vst.msk [vmem:[%s1591_s26 + $0x18] sm:$0xf] %vm1026_vm7, %v1198_v14  ;;  %v1298_v16 = vpop.f32.mrf.mxu1 }
 0x2fd   : > { %v1203_v19 = vpack.c.bf16 %v1298_v16, %v1298_v16  ;;  %v897_v21 = vpop.f32.mrf.mxu0 }
 0x2fe   : > { %v1199_v22 = vpack.c.bf16 %v897_v21, %v897_v21  ;;  %v960_v23 = vpop.f32.mrf.mxu1 }
 0x2ff   : > { %v1048_v24 = vsel %vm1593_vm6, %v1203_v19, %v1047_v17  ;;  %v1201_v26 = vpack.c.bf16 %v960_v23, %v960_v23 }
 0x300   : > { %1049 = vst [vmem:[%s1591_s26 + $0x2c] sm:$0x1] %v1048_v24  ;;  %1041 = vst.msk [vmem:[%s1591_s26 + $0x1c] sm:$0xf] %vm1026_vm7, %v1199_v22  ;;  %v1299_v27 = vpop.f32.mrf.mxu1 }
 0x301   : > { %1045 = vst.msk [vmem:[%s1591_s26 + $0x24] sm:$0xf] %vm1026_vm7, %v1201_v26 }
 0x302   : > { %v963_v29 = vpop.f32.mrf.mxu1 }
 0x303   : > { %v1202_v30 = vpack.c.bf16 %v963_v29, %v963_v29 }
 0x305   : > { %1046 = vst.msk [vmem:[%s1591_s26 + $0x28] sm:$0xf] %vm1026_vm7, %v1202_v30 }
 0x306 PF: > { %s13_s12 = sadd.s32 1, %s1396_s12  }
 0x307   : > { %p10_p4 = scmp.ge.s32.totalorder %s13_s12, 4  }
 0x309   :  { %12 = sbr.rel (!%p10_p4) target bundleno = 1 (0x1), region = 68 }

// kernel: _lambda_.20
= control target key start
LH: loop header
LB: loop body
LE: loop exit
PB: predicated region body
PF: predicated region fallthrough
CT: control target
= control target key end

     0   :  { %vm24_vm0 = vcmask 261120   ;;  %vm37_vm1 = vcmask 254976   ;;  %vm137_vm2 = vcmask 257024   ;;  %vm142_vm3 = vcmask 253952   ;;  %s243_s0 = inlined_call_operand.vmem [shape: bf16[34,32], index: 0, kind: input, shape index: {}]   ;;  %s244_s1 = inlined_call_operand.vmem [shape: f32[1,32], index: 1, kind: input, shape index: {}]   ;;  %s245_s2 = inlined_call_operand.vmem [shape: f32[1,32], index: 2, kind: input, shape index: {}]   ;;  %s246_s3 = inlined_call_operand.vmem [shape: bf16[34,32], index: 3, kind: output, shape index: {}]  }
   0x1   :  { %v161_v0 = vld [vmem:[%s243_s0] sm:$0xff]   ;;  %v168_v1 = vld [vmem:[%s243_s0 + $0x8] sm:$0xff]   ;;  %v18_v6 = vld [vmem:[%s243_s0 + $0x10] sm:$0x1] }
   0x2   :  { %v162_v2 = vunpack.c.l.bf16 %v161_v0  ;;  %v166_v3 = vunpack.c.l.bf16 %v168_v1  ;;  %v163_v4 = vunpack.c.h.bf16 %v161_v0  ;;  %v167_v5 = vunpack.c.h.bf16 %v168_v1  ;;  %v148_v54 = vld [vmem:[%s244_s1] ss:$0 sm:$0xff] }
   0x3   :  { %v23_v11 = vunpack.c.l.bf16 %v18_v6  ;;  %v149_v56 = vld [vmem:[%s245_s2] ss:$0 sm:$0xff] }
   0x4   :  { %v25_v7 = vsel %vm24_vm0, %v162_v2, 0.0  ;;  %v31_v8 = vsel %vm24_vm0, %v166_v3, 0.0  ;;  %v28_v9 = vsel %vm24_vm0, %v163_v4, 0.0  ;;  %v34_v10 = vsel %vm24_vm0, %v167_v5, 0.0 }
   0x5   :  { %26 = vadd.xlane.f32.xlu0 %v25_v7  ;;  %32 = vadd.xlane.f32.xlu1 %v31_v8  ;;  %v38_v12 = vsel %vm37_vm1, %v23_v11, 0.0 }
   0x9   :  { %29 = vadd.xlane.f32.xlu0 %v28_v9  ;;  %35 = vadd.xlane.f32.xlu1 %v34_v10 }
   0xd   :  { %39 = vadd.xlane.f32.xlu0 %v38_v12 }
  0x8e   :  { %v27_v13 = vpop.xlane.xlu0 %26  ;;  %v33_v14 = vpop.xlane.xlu1 %32 }
  0x8f   :  { %v42_v15 = vmul.f32 0.03125, %v27_v13  ;;  %v44_v16 = vmul.f32 0.03125, %v33_v14 }
  0x91   :  { %v47_v17 = vsub.f32 %v162_v2, %v42_v15  ;;  %v49_v18 = vsub.f32 %v166_v3, %v44_v16 }
  0x92   :  { %v30_v19 = vpop.xlane.xlu0 %29  ;;  %v36_v20 = vpop.xlane.xlu1 %35 }
  0x93   :  { %v43_v21 = vmul.f32 0.03125, %v30_v19  ;;  %v45_v22 = vmul.f32 0.03125, %v36_v20  ;;  %v52_v23 = vmul.f32 %v47_v17, %v47_v17  ;;  %v54_v24 = vmul.f32 %v49_v18, %v49_v18 }
  0x95   :  { %v48_v25 = vsub.f32 %v163_v4, %v43_v21  ;;  %v50_v26 = vsub.f32 %v167_v5, %v45_v22  ;;  %v57_v27 = vsel %vm24_vm0, %v52_v23, 0.0  ;;  %v63_v30 = vsel %vm24_vm0, %v54_v24, 0.0 }
  0x96   :  { %58 = vadd.xlane.f32.xlu1 %v57_v27  ;;  %v40_v28 = vpop.xlane.xlu0 %39 }
  0x97   :  { %v46_v29 = vmul.f32 0.03125, %v40_v28  ;;  %v53_v31 = vmul.f32 %v48_v25, %v48_v25  ;;  %v55_v32 = vmul.f32 %v50_v26, %v50_v26 }
  0x99   :  { %v51_v33 = vsub.f32 %v23_v11, %v46_v29  ;;  %v60_v34 = vsel %vm24_vm0, %v53_v31, 0.0  ;;  %v66_v35 = vsel %vm24_vm0, %v55_v32, 0.0 }
  0x9a   :  { %64 = vadd.xlane.f32.xlu1 %v63_v30  ;;  %61 = vadd.xlane.f32.xlu0 %v60_v34 }
  0x9b   :  { %v56_v36 = vmul.f32 %v51_v33, %v51_v33 }
  0x9d   :  { %v69_v37 = vsel %vm37_vm1, %v56_v36, 0.0 }
  0x9e   :  { %67 = vadd.xlane.f32.xlu0 %v66_v35  ;;  %70 = vadd.xlane.f32.xlu1 %v69_v37 }
 0x11f   :  { %v59_v38 = vpop.xlane.xlu1 %58 }
 0x120   :  { %v72_v39 = vmul.f32 0.03125, %v59_v38 }
 0x122   :  { %v77_v40 = vadd.f32 1e-12, %v72_v39 }
 0x123   :  { %v65_v41 = vpop.xlane.xlu1 %64  ;;  %v62_v42 = vpop.xlane.xlu0 %61 }
 0x124   :  { %169 = vrsqrt.f32 %v77_v40  ;;  %v74_v43 = vmul.f32 0.03125, %v65_v41  ;;  %v73_v44 = vmul.f32 0.03125, %v62_v42 }
 0x126   :  { %v79_v45 = vadd.f32 1e-12, %v74_v43  ;;  %v78_v46 = vadd.f32 1e-12, %v73_v44 }
 0x127   :  { %v71_v47 = vpop.xlane.xlu1 %70  ;;  %v68_v48 = vpop.xlane.xlu0 %67 }
 0x128   :  { %171 = vrsqrt.f32 %v79_v45  ;;  %v76_v49 = vmul.f32 0.03125, %v71_v47  ;;  %v75_v50 = vmul.f32 0.03125, %v68_v48 }
 0x129   :  { %173 = vrsqrt.f32 %v78_v46 }
 0x12a   :  { %v81_v51 = vadd.f32 1e-12, %v76_v49  ;;  %v80_v52 = vadd.f32 1e-12, %v75_v50 }
 0x12c   :  { %175 = vrsqrt.f32 %v81_v51 }
 0x12d   :  { %177 = vrsqrt.f32 %v80_v52 }
 0x131   :  { %v170_v53 = vpop.eup %169 }
 0x132   :  { %v87_v55 = vmul.f32 %v170_v53, %v47_v17 }
 0x134   :  { %v99_v57 = vmul.f32 %v148_v54, %v87_v55 }
 0x135   :  { %v172_v58 = vpop.eup %171 }
 0x136   :  { %v174_v59 = vpop.eup %173  ;;  %v111_v60 = vadd.f32 %v149_v56, %v99_v57  ;;  %v89_v61 = vmul.f32 %v172_v58, %v49_v18 }
 0x137   :  { %v88_v62 = vmul.f32 %v174_v59, %v48_v25 }
 0x138   :  { %v155_v63 = vpack.c.bf16 %v111_v60, %v111_v60  ;;  %v101_v0 = vmul.f32 %v148_v54, %v89_v61 }
 0x139   :  { %v176_v1 = vpop.eup %175  ;;  %v100_v2 = vmul.f32 %v148_v54, %v88_v62 }
 0x13a   :  { %v178_v3 = vpop.eup %177  ;;  %138 = vst.msk [vmem:[%s246_s3] sm:$0xf] %vm137_vm2, %v155_v63  ;;  %v113_v4 = vadd.f32 %v149_v56, %v101_v0  ;;  %v91_v5 = vmul.f32 %v176_v1, %v51_v33 }
 0x13b   :  { %v112_v6 = vadd.f32 %v149_v56, %v100_v2  ;;  %v90_v7 = vmul.f32 %v178_v3, %v50_v26 }
 0x13c   :  { %v157_v8 = vpack.c.bf16 %v113_v4, %v113_v4  ;;  %v103_v9 = vmul.f32 %v148_v54, %v91_v5 }
 0x13d   :  { %v156_v10 = vpack.c.bf16 %v112_v6, %v112_v6  ;;  %v102_v11 = vmul.f32 %v148_v54, %v90_v7 }
 0x13e   :  { %140 = vst.msk [vmem:[%s246_s3 + $0x8] sm:$0xf] %vm137_vm2, %v157_v8  ;;  %v115_v12 = vadd.f32 %v149_v56, %v103_v9 }
 0x13f   :  { %139 = vst.msk [vmem:[%s246_s3 + $0x4] sm:$0xf] %vm137_vm2, %v156_v10  ;;  %v114_v13 = vadd.f32 %v149_v56, %v102_v11 }
 0x140   :  { %v159_v14 = vpack.c.bf16 %v115_v12, %v115_v12 }
 0x141   :  { %v158_v15 = vpack.c.bf16 %v114_v13, %v114_v13 }
 0x142   :  { %143 = vst.msk [vmem:[%s246_s3 + $0x10] sm:$0x1] %vm142_vm3, %v159_v14 }
 0x143   :  { %141 = vst.msk [vmem:[%s246_s3 + $0xc] sm:$0xf] %vm137_vm2, %v158_v15 }

// kernel: _lambda_.14
= control target key start
LH: loop header
LB: loop body
LE: loop exit
PB: predicated region body
PF: predicated region fallthrough
CT: control target
= control target key end

     0   :  { %vm22_vm0 = vcmask 261120   ;;  %v272_v0 = vmov 0.0   ;;  %vm273_vm1 = vmmov 0   ;;  %vm27_vm2 = vcmask 254976   ;;  %s358_s1 = inlined_call_operand.vmem [shape: bf16[32,32], index: 1, kind: input, shape index: {}]   ;;  %s359_s0 = inlined_call_operand.vmem [shape: bf16[34,32], index: 0, kind: input, shape index: {}]   ;;  %s360_s3 = inlined_call_operand.vmem [shape: bf16[34,32], index: 3, kind: input, shape index: {}]   ;;  %s361_s2 = inlined_call_operand.vmem [shape: f32[1,32], index: 2, kind: input, shape index: {}]   ;;  %s362_s4 = inlined_call_operand.vmem [shape: bf16[34,32], index: 4, kind: output, shape index: {}]  }
   0x1   :  { %245 = vmatprep.subr.bf16.mxu0 %v272_v0  ;;  %261 = vmatprep.subr.bf16.mxu1 %v272_v0  ;;  %v267_v1 = vld [vmem:[%s358_s1 + $0x8] sm:$0xff]   ;;  %23 = vst.msk [vmem:[#allocation2] sm:$0xff] %vm22_vm0, %v272_v0  ;;  %24 = vst.msk [vmem:[#allocation2 + $0x8] sm:$0xff] %vm22_vm0, %v272_v0  ;;  %v268_v2 = vld [vmem:[%s358_s1] sm:$0xff]   ;;  %vm201_vm3 = vcmask 257024   ;;  %vm206_vm4 = vcmask 253952  }
   0x2   :  { %25 = vst.msk [vmem:[#allocation2 + $0x10] sm:$0xff] %vm22_vm0, %v272_v0  ;;  %26 = vst.msk [vmem:[#allocation2 + $0x18] sm:$0xff] %vm22_vm0, %v272_v0  ;;  %249 = vmatprep.mubr.msk.bf16.mxu0 %vm273_vm1, %v272_v0  ;;  %253 = vmatprep.mubr.msk.bf16.mxu1 %vm273_vm1, %v272_v0  ;;  %v269_v3 = vld [vmem:[%s359_s0] sm:$0xff]   ;;  %v270_v4 = vld [vmem:[%s359_s0 + $0x8] sm:$0xff]  }
   0x3   :  { %246 = vmatpush3.bf16.msra.mxu0 %v267_v1  ;;  %263 = vmatpush3.bf16.msra.mxu1 %v267_v1  ;;  %v271_v5 = vld [vmem:[%s359_s0 + $0x10] ss:$0 sps:$4 sm:$0x11]   ;;  %28 = vst.msk [vmem:[#allocation2 + $0x20] sm:$0x3] %vm27_vm2, %v272_v0  ;;  %v232_v20 = vld [vmem:[%s360_s3] sm:$0xff]  }
   0x4   :  { %247 = vmatprep.subr.bf16.mxu0 %v272_v0  ;;  %262 = vmatprep.subr.bf16.mxu1 %v272_v0  ;;  %v239_v21 = vld [vmem:[%s360_s3 + $0x8] sm:$0xff]   ;;  %v220_v25 = vld [vmem:[%s361_s2] ss:$0 sm:$0xff]  ;;  %v233_v27 = vunpack.c.l.bf16 %v232_v20  ;;  %v234_v38 = vunpack.c.h.bf16 %v232_v20  ;;  %v169_v42 = vld [vmem:[%s360_s3 + $0x10] sm:$0x1] }
   0x5   :  { %v237_v28 = vunpack.c.l.bf16 %v239_v21  ;;  %v238_v39 = vunpack.c.h.bf16 %v239_v21  ;;  %v174_v50 = vunpack.c.l.bf16 %v169_v42 }
   0x7   :  { %248 = vmatpush3.bf16.msra.mxu0 %v268_v2  ;;  %264 = vmatpush3.bf16.msra.mxu1 %v268_v2 }
   0x8   :  { %v29_v6 = vld [vmem:[#allocation2] sm:$0xff]  ;;  %v30_v14 = vld [vmem:[#allocation2 + $0x8] sm:$0xff] }
   0x9   :  { %v31_v7 = vld [vmem:[#allocation2 + $0x10] sm:$0xff]  ;;  %v32_v15 = vld [vmem:[#allocation2 + $0x18] sm:$0xff] }
   0xa   :  { %250 = vmatmul.mubr.msk.bf16.vlgmr.msra.gmra.mxu0 %vm22_vm0, %v269_v3  ;;  %254 = vmatmul.mubr.msk.bf16.vlgmr.msra.gmra.mxu1 %vm22_vm0, %v270_v4  ;;  %v33_v24 = vld [vmem:[#allocation2 + $0x20] sm:$0x3] }
   0xb   :  { %257 = vmatprep.mubr.msk.bf16.mxu1 %vm273_vm1, %v272_v0 }
  0x12   :  { %258 = vmatmul.mubr.msk.bf16.gmra.mxu1 %vm22_vm0, %v271_v5 }
  0xca   :  { %v112_v8 = vpop.f32.mrf.mxu0  ;;  %v120_v9 = vpop.f32.mrf.mxu1 }
  0xcb   :  { %v134_v10 = vadd.f32 %v112_v8, %v29_v6  ;;  %v136_v11 = vadd.f32 %v120_v9, %v31_v7 }
  0xcc   :  { %v251_v12 = vpop.f32.mrf.mxu0  ;;  %v255_v13 = vpop.f32.mrf.mxu1 }
  0xcd   :  { %139 = vst.msk [vmem:[#allocation2] sm:$0xff] %vm22_vm0, %v134_v10  ;;  %141 = vst.msk [vmem:[#allocation2 + $0x10] sm:$0xff] %vm22_vm0, %v136_v11 }
  0xce   :  { %v115_v16 = vpop.f32.mrf.mxu0  ;;  %v123_v17 = vpop.f32.mrf.mxu1 }
  0xcf   :  { %v135_v18 = vadd.f32 %v115_v16, %v30_v14  ;;  %v137_v19 = vadd.f32 %v123_v17, %v32_v15 }
  0xd0   :  { %v252_v22 = vpop.f32.mrf.mxu0  ;;  %v256_v23 = vpop.f32.mrf.mxu1 }
  0xd1   :  { %140 = vst.msk [vmem:[#allocation2 + $0x8] sm:$0xff] %vm22_vm0, %v135_v18  ;;  %142 = vst.msk [vmem:[#allocation2 + $0x18] sm:$0xff] %vm22_vm0, %v137_v19 }
  0xd2   :  { %v128_v26 = vpop.f32.mrf.mxu1 }
  0xd3   :  { %v138_v29 = vadd.f32 %v128_v26, %v33_v24 }
  0xd4   :  { %v148_v30 = vld [vmem:[#allocation2] sm:$0xff]  ;;  %v150_v31 = vld [vmem:[#allocation2 + $0x10] sm:$0xff]  ;;  %v259_v32 = vpop.f32.mrf.mxu1 }
  0xd5   :  { %v160_v33 = vadd.f32 %v220_v25, %v148_v30  ;;  %v162_v34 = vadd.f32 %v220_v25, %v150_v31  ;;  %144 = vst.msk [vmem:[#allocation2 + $0x20] sm:$0x3] %vm27_vm2, %v138_v29 }
  0xd6   :  { %v131_v35 = vpop.f32.mrf.mxu1 }
  0xd7   :  { %v175_v36 = vadd.f32 %v233_v27, %v160_v33  ;;  %v177_v37 = vadd.f32 %v237_v28, %v162_v34 }
  0xd8   :  { %v149_v40 = vld [vmem:[#allocation2 + $0x8] sm:$0xff]  ;;  %v151_v41 = vld [vmem:[#allocation2 + $0x18] sm:$0xff]  ;;  %v260_v43 = vpop.f32.mrf.mxu1 }
  0xd9   :  { %v226_v44 = vpack.c.bf16 %v175_v36, %v175_v36  ;;  %v228_v45 = vpack.c.bf16 %v177_v37, %v177_v37  ;;  %v161_v46 = vadd.f32 %v220_v25, %v149_v40  ;;  %v163_v47 = vadd.f32 %v220_v25, %v151_v41 }
  0xdb   :  { %202 = vst.msk [vmem:[%s362_s4] sm:$0xf] %vm201_vm3, %v226_v44  ;;  %204 = vst.msk [vmem:[%s362_s4 + $0x8] sm:$0xf] %vm201_vm3, %v228_v45  ;;  %v176_v48 = vadd.f32 %v234_v38, %v161_v46  ;;  %v178_v49 = vadd.f32 %v238_v39, %v163_v47 }
  0xdc   :  { %v152_v51 = vld [vmem:[#allocation2 + $0x20] sm:$0x3] }
  0xdd   :  { %v227_v52 = vpack.c.bf16 %v176_v48, %v176_v48  ;;  %v229_v53 = vpack.c.bf16 %v178_v49, %v178_v49  ;;  %v164_v54 = vadd.f32 %v220_v25, %v152_v51 }
  0xdf   :  { %203 = vst.msk [vmem:[%s362_s4 + $0x4] sm:$0xf] %vm201_vm3, %v227_v52  ;;  %205 = vst.msk [vmem:[%s362_s4 + $0xc] sm:$0xf] %vm201_vm3, %v229_v53  ;;  %v179_v55 = vadd.f32 %v174_v50, %v164_v54 }
  0xe1   :  { %v230_v56 = vpack.c.bf16 %v179_v55, %v179_v55 }
  0xe3   :  { %207 = vst.msk [vmem:[%s362_s4 + $0x10] sm:$0x1] %vm206_vm4, %v230_v56 }

// kernel: _lambda_.15
= control target key start
LH: loop header
LB: loop body
LE: loop exit
PB: predicated region body
PF: predicated region fallthrough
CT: control target
= control target key end

     0   :  { %vm37_vm0 = vcmask 261120   ;;  %vm50_vm1 = vcmask 254976   ;;  %v521_v38 = vmov 0.0   ;;  %vm522_vm2 = vmmov 0   ;;  %s695_s0 = inlined_call_operand.vmem [shape: bf16[34,32], index: 0, kind: input, shape index: {}]   ;;  %s696_s3 = inlined_call_operand.vmem [shape: bf16[32,64], index: 3, kind: input, shape index: {}]   ;;  %s697_s1 = inlined_call_operand.vmem [shape: f32[1,32], index: 1, kind: input, shape index: {}]   ;;  %s698_s2 = inlined_call_operand.vmem [shape: f32[1,32], index: 2, kind: input, shape index: {}]   ;;  %s699_s5 = inlined_call_operand.vmem [shape: bf16[64,32], index: 5, kind: input, shape index: {}]   ;;  %s700_s4 = inlined_call_operand.vmem [shape: f32[1,64], index: 4, kind: input, shape index: {}]   ;;  %s701_s6 = inlined_call_operand.vmem [shape: f32[1,32], index: 6, kind: input, shape index: {}]   ;;  %s702_s7 = inlined_call_operand.vmem [shape: bf16[34,32], index: 7, kind: output, shape index: {}]  }
   0x1   :  { %v437_v0 = vld [vmem:[%s695_s0] sm:$0xff]   ;;  %v444_v1 = vld [vmem:[%s695_s0 + $0x8] sm:$0xff]   ;;  %v31_v6 = vld [vmem:[%s695_s0 + $0x10] sm:$0x1]  ;;  %457 = vmatprep.subr.bf16.mxu0 %v521_v38  ;;  %461 = vmatprep.mubr.msk.bf16.mxu0 %vm522_vm2, %v521_v38  ;;  %vm307_vm3 = vcmask 523264   ;;  %vm399_vm4 = vcmask 257024  }
   0x2   :  { %v569_v2 = vunpack.c.l.bf16 %v437_v0  ;;  %v571_v3 = vunpack.c.l.bf16 %v444_v1  ;;  %v573_v4 = vunpack.c.h.bf16 %v437_v0  ;;  %v575_v5 = vunpack.c.h.bf16 %v444_v1  ;;  %v495_v39 = vld [vmem:[%s696_s3 + $0x8] sm:$0xff]   ;;  %473 = vmatprep.subr.bf16.mxu1 %v521_v38  ;;  %481 = vmatprep.mubr.msk.bf16.mxu1 %vm522_vm2, %v521_v38  ;;  %v496_v40 = vld [vmem:[%s696_s3] sm:$0xff]  }
   0x3   :  { %v588_v11 = vunpack.c.l.bf16 %v31_v6  ;;  %458 = vmatpush3.bf16.msra.mxu0 %v495_v39  ;;  %v410_v58 = vld [vmem:[%s697_s1] ss:$0 sm:$0xff]  ;;  %vm404_vm5 = vcmask 253952  }
   0x4   :  { %v38_v7 = vsel %vm37_vm0, %v569_v2, 0.0  ;;  %v44_v8 = vsel %vm37_vm0, %v571_v3, 0.0  ;;  %v41_v9 = vsel %vm37_vm0, %v573_v4, 0.0  ;;  %v47_v10 = vsel %vm37_vm0, %v575_v5, 0.0  ;;  %459 = vmatprep.subr.bf16.mxu0 %v521_v38  ;;  %v411_v63 = vld [vmem:[%s698_s2] ss:$0 sm:$0xff] }
   0x5   :  { %39 = vadd.xlane.f32.xlu0 %v38_v7  ;;  %45 = vadd.xlane.f32.xlu1 %v44_v8  ;;  %v51_v12 = vsel %vm50_vm1, %v588_v11, 0.0 }
   0x7   :  { %460 = vmatpush3.bf16.msra.mxu0 %v496_v40 }
   0x9   :  { %42 = vadd.xlane.f32.xlu0 %v41_v9  ;;  %48 = vadd.xlane.f32.xlu1 %v47_v10 }
   0xd   :  { %52 = vadd.xlane.f32.xlu0 %v51_v12 }
  0x8e   :  { %v40_v13 = vpop.xlane.xlu0 %39  ;;  %v46_v14 = vpop.xlane.xlu1 %45 }
  0x8f   :  { %v55_v15 = vmul.f32 0.03125, %v40_v13  ;;  %v57_v16 = vmul.f32 0.03125, %v46_v14 }
  0x91   :  { %v60_v17 = vsub.f32 %v569_v2, %v55_v15  ;;  %v594_v18 = vsub.f32 %v571_v3, %v57_v16 }
  0x92   :  { %v43_v19 = vpop.xlane.xlu0 %42  ;;  %v49_v20 = vpop.xlane.xlu1 %48 }
  0x93   :  { %v56_v21 = vmul.f32 0.03125, %v43_v19  ;;  %v58_v22 = vmul.f32 0.03125, %v49_v20  ;;  %v65_v23 = vmul.f32 %v60_v17, %v60_v17  ;;  %v67_v24 = vmul.f32 %v594_v18, %v594_v18 }
  0x95   :  { %v61_v25 = vsub.f32 %v573_v4, %v56_v21  ;;  %v600_v26 = vsub.f32 %v575_v5, %v58_v22  ;;  %v70_v27 = vsel %vm37_vm0, %v65_v23, 0.0  ;;  %v76_v30 = vsel %vm37_vm0, %v67_v24, 0.0  ;;  %v497_v22 = vld [vmem:[%s699_s5 + $0x18] sm:$0xff]   ;;  %v498_v23 = vld [vmem:[%s699_s5 + $0x10] sm:$0xff]   ;;  %v499_v24 = vld [vmem:[%s699_s5 + $0x8] sm:$0xff]  }
  0x96   :  { %71 = vadd.xlane.f32.xlu1 %v70_v27  ;;  %v53_v28 = vpop.xlane.xlu0 %52  ;;  %474 = vmatpush3.bf16.msra.mxu1 %v497_v22 }
  0x97   :  { %v59_v29 = vmul.f32 0.03125, %v53_v28  ;;  %v66_v31 = vmul.f32 %v61_v25, %v61_v25  ;;  %v68_v32 = vmul.f32 %v600_v26, %v600_v26  ;;  %475 = vmatprep.subr.bf16.mxu1 %v521_v38 }
  0x99   :  { %v607_v33 = vsub.f32 %v588_v11, %v59_v29  ;;  %v73_v34 = vsel %vm37_vm0, %v66_v31, 0.0  ;;  %v79_v35 = vsel %vm37_vm0, %v68_v32, 0.0 }
  0x9a   :  { %77 = vadd.xlane.f32.xlu1 %v76_v30  ;;  %74 = vadd.xlane.f32.xlu0 %v73_v34 }
  0x9b   :  { %v69_v36 = vmul.f32 %v607_v33, %v607_v33  ;;  %476 = vmatpush3.bf16.msra.mxu1 %v498_v23 }
  0x9c   :  { %477 = vmatprep.subr.bf16.mxu1 %v521_v38 }
  0x9d   :  { %v82_v37 = vsel %vm50_vm1, %v69_v36, 0.0 }
  0x9e   :  { %80 = vadd.xlane.f32.xlu0 %v79_v35  ;;  %83 = vadd.xlane.f32.xlu1 %v82_v37 }
  0x9f   :  { %478 = vmatpush3.bf16.msra.mxu1 %v499_v24 }
  0xa0   :  { %479 = vmatprep.subr.bf16.mxu1 %v521_v38 }
 0x11f   :  { %v72_v41 = vpop.xlane.xlu1 %71 }
 0x120   :  { %v85_v42 = vmul.f32 0.03125, %v72_v41 }
 0x122   :  { %v90_v43 = vadd.f32 1e-12, %v85_v42 }
 0x123   :  { %v78_v44 = vpop.xlane.xlu1 %77  ;;  %v75_v45 = vpop.xlane.xlu0 %74 }
 0x124   :  { %501 = vrsqrt.f32 %v90_v43  ;;  %v87_v46 = vmul.f32 0.03125, %v78_v44  ;;  %v86_v47 = vmul.f32 0.03125, %v75_v45 }
 0x126   :  { %v91_v48 = vadd.f32 1e-12, %v86_v47  ;;  %v92_v49 = vadd.f32 1e-12, %v87_v46 }
 0x127   :  { %v84_v50 = vpop.xlane.xlu1 %83  ;;  %v81_v51 = vpop.xlane.xlu0 %80 }
 0x128   :  { %v88_v52 = vmul.f32 0.03125, %v81_v51  ;;  %503 = vrsqrt.f32 %v91_v48  ;;  %v89_v53 = vmul.f32 0.03125, %v84_v50 }
 0x129   :  { %505 = vrsqrt.f32 %v92_v49 }
 0x12a   :  { %v93_v54 = vadd.f32 1e-12, %v88_v52  ;;  %v94_v55 = vadd.f32 1e-12, %v89_v53 }
 0x12c   :  { %507 = vrsqrt.f32 %v93_v54 }
 0x12d   :  { %509 = vrsqrt.f32 %v94_v55 }
 0x131   :  { %v502_v56 = vpop.eup %501 }
 0x132   :  { %v100_v57 = vmul.f32 %v502_v56, %v60_v17 }
 0x134   :  { %v112_v61 = vmul.f32 %v410_v58, %v100_v57 }
 0x135   :  { %v504_v59 = vpop.eup %503 }
 0x136   :  { %v101_v60 = vmul.f32 %v504_v59, %v61_v25  ;;  %v506_v62 = vpop.eup %505  ;;  %v124_v6 = vadd.f32 %v411_v63, %v112_v61  ;;  %v500_v25 = vld [vmem:[%s699_s5] sm:$0xff]  }
 0x137   :  { %v102_v8 = vmul.f32 %v506_v62, %v594_v18  ;;  %480 = vmatpush3.bf16.msra.mxu1 %v500_v25 }
 0x138   :  { %v113_v0 = vmul.f32 %v410_v58, %v101_v60 }
 0x139   :  { %v508_v1 = vpop.eup %507  ;;  %v114_v14 = vmul.f32 %v410_v58, %v102_v8 }
 0x13a   :  { %v125_v7 = vadd.f32 %v411_v63, %v113_v0  ;;  %v103_v9 = vmul.f32 %v508_v1, %v600_v26  ;;  %v510_v13 = vpop.eup %509  ;;  %v412_v26 = vld [vmem:[%s700_s4] ss:$0 sm:$0xff] }
 0x13b   :  { %v104_v16 = vmul.f32 %v510_v13, %v607_v33  ;;  %v126_v17 = vadd.f32 %v411_v63, %v114_v14 }
 0x13c   :  { %v129_v10 = vpack.c.bf16 %v125_v7, %v124_v6  ;;  %v115_v12 = vmul.f32 %v410_v58, %v103_v9 }
 0x13d   :  { %v116_v20 = vmul.f32 %v410_v58, %v104_v16 }
 0x13e   :  { %462 = vmatmul.mubr.msk.bf16.vlgmr.msra.gmra.mxu0 %vm37_vm0, %v129_v10  ;;  %v127_v15 = vadd.f32 %v411_v63, %v115_v12 }
 0x13f   :  { %465 = vmatprep.mubr.msk.bf16.mxu0 %vm522_vm2, %v521_v38  ;;  %v128_v18 = vadd.f32 %v411_v63, %v116_v20 }
 0x140   :  { %v130_v19 = vpack.c.bf16 %v127_v15, %v126_v17 }
 0x141   :  { %v131_v21 = vpack.c.bf16 %v128_v18, %v128_v18 }
 0x146   :  { %466 = vmatmul.mubr.msk.bf16.gmra.mxu0 %vm37_vm0, %v130_v19 }
 0x147   :  { %469 = vmatprep.mubr.msk.bf16.mxu0 %vm522_vm2, %v521_v38 }
 0x14e   :  { %470 = vmatmul.mubr.msk.bf16.gmra.mxu0 %vm37_vm0, %v131_v21 }
 0x1fe   :  { %v198_v27 = vpop.f32.mrf.mxu0 }
 0x1ff   :  { %v199_v28 = vadd.f32 %v412_v26, %v198_v27 }
 0x200   :  { %v463_v29 = vpop.f32.mrf.mxu0 }
 0x201   :  { %v220_v30 = vmul.f32 %v199_v28, %v199_v28 }
 0x202   :  { %v201_v31 = vpop.f32.mrf.mxu0 }
 0x203   :  { %v225_v32 = vmul.f32 %v220_v30, %v199_v28  ;;  %v202_v33 = vadd.f32 %v412_v26, %v201_v31 }
 0x204   :  { %v464_v34 = vpop.f32.mrf.mxu0 }
 0x205   :  { %v230_v35 = vmul.f32 0.044715, %v225_v32  ;;  %v221_v36 = vmul.f32 %v202_v33, %v202_v33  ;;  %v418_v34 = vld [vmem:[%s701_s6] ss:$0 sm:$0xff] }
 0x206   :  { %v206_v37 = vpop.f32.mrf.mxu0 }
 0x207   :  { %v235_v39 = vadd.f32 %v230_v35, %v199_v28  ;;  %v226_v40 = vmul.f32 %v221_v36, %v202_v33  ;;  %v207_v41 = vadd.f32 %v412_v26, %v206_v37 }
 0x208   :  { %v467_v42 = vpop.f32.mrf.mxu0 }
 0x209   :  { %v240_v43 = vmul.f32 0.7978846, %v235_v39  ;;  %v231_v44 = vmul.f32 0.044715, %v226_v40  ;;  %v222_v45 = vmul.f32 %v207_v41, %v207_v41 }
 0x20a   :  { %v209_v46 = vpop.f32.mrf.mxu0 }
 0x20b   :  { %511 = vtanh.f32 %v240_v43  ;;  %v236_v47 = vadd.f32 %v231_v44, %v202_v33  ;;  %v227_v48 = vmul.f32 %v222_v45, %v207_v41  ;;  %v210_v49 = vadd.f32 %v412_v26, %v209_v46 }
 0x20c   :  { %v468_v50 = vpop.f32.mrf.mxu0 }
 0x20d   :  { %v241_v51 = vmul.f32 0.7978846, %v236_v47  ;;  %v232_v52 = vmul.f32 0.044715, %v227_v48  ;;  %v223_v53 = vmul.f32 %v210_v49, %v210_v49 }
 0x20e   :  { %v214_v54 = vpop.f32.mrf.mxu0 }
 0x20f   :  { %513 = vtanh.f32 %v241_v51  ;;  %v237_v55 = vadd.f32 %v232_v52, %v207_v41  ;;  %v228_v56 = vmul.f32 %v223_v53, %v210_v49  ;;  %v215_v57 = vadd.f32 %v412_v26, %v214_v54 }
 0x210   :  { %v471_v58 = vpop.f32.mrf.mxu0 }
 0x211   :  { %v242_v59 = vmul.f32 0.7978846, %v237_v55  ;;  %v233_v60 = vmul.f32 0.044715, %v228_v56  ;;  %v224_v61 = vmul.f32 %v215_v57, %v215_v57 }
 0x212   :  { %v217_v62 = vpop.f32.mrf.mxu0 }
 0x213   :  { %515 = vtanh.f32 %v242_v59  ;;  %v238_v63 = vadd.f32 %v233_v60, %v210_v49  ;;  %v229_v0 = vmul.f32 %v224_v61, %v215_v57 }
 0x214   :  { %v472_v1 = vpop.f32.mrf.mxu0 }
 0x215   :  { %v243_v6 = vmul.f32 0.7978846, %v238_v63  ;;  %v234_v7 = vmul.f32 0.044715, %v229_v0 }
 0x217   :  { %517 = vtanh.f32 %v243_v6  ;;  %v239_v8 = vadd.f32 %v234_v7, %v215_v57 }
 0x218   :  { %v512_v9 = vpop.eup %511 }
 0x219   :  { %v250_v10 = vadd.f32 1.0, %v512_v9  ;;  %v244_v12 = vmul.f32 0.7978846, %v239_v8 }
 0x21b   :  { %519 = vtanh.f32 %v244_v12  ;;  %v255_v14 = vmul.f32 0.5, %v250_v10 }
 0x21c   :  { %v514_v13 = vpop.eup %513 }
 0x21d   :  { %v251_v15 = vadd.f32 1.0, %v514_v13  ;;  %v260_v19 = vmul.f32 %v255_v14, %v199_v28 }
 0x21f   :  { %v256_v16 = vmul.f32 0.5, %v251_v15 }
 0x220   :  { %v516_v17 = vpop.eup %515 }
 0x221   :  { %v261_v20 = vmul.f32 %v256_v16, %v202_v33  ;;  %v252_v18 = vadd.f32 1.0, %v516_v17 }
 0x223   :  { %v265_v21 = vpack.c.bf16 %v261_v20, %v260_v19  ;;  %v257_v23 = vmul.f32 0.5, %v252_v18 }
 0x224   :  { %v518_v22 = vpop.eup %517 }
 0x225   :  { %v253_v24 = vadd.f32 1.0, %v518_v22  ;;  %482 = vmatmul.mubr.msk.bf16.vlgmr.msra.gmra.mxu1 %vm307_vm3, %v265_v21  ;;  %v262_v27 = vmul.f32 %v257_v23, %v207_v41 }
 0x226   :  { %485 = vmatprep.mubr.msk.bf16.mxu1 %vm522_vm2, %v521_v38 }
 0x227   :  { %v258_v25 = vmul.f32 0.5, %v253_v24 }
 0x228   :  { %v520_v26 = vpop.eup %519 }
 0x229   :  { %v263_v29 = vmul.f32 %v258_v25, %v210_v49  ;;  %v254_v30 = vadd.f32 1.0, %v520_v26 }
 0x22b   :  { %v266_v31 = vpack.c.bf16 %v263_v29, %v262_v27  ;;  %v259_v32 = vmul.f32 0.5, %v254_v30 }
 0x22d   :  { %486 = vmatmul.mubr.msk.bf16.gmra.mxu1 %vm307_vm3, %v266_v31  ;;  %v264_v28 = vmul.f32 %v259_v32, %v215_v57 }
 0x22e   :  { %489 = vmatprep.mubr.msk.bf16.mxu1 %vm522_vm2, %v521_v38 }
 0x22f   :  { %v267_v33 = vpack.c.bf16 %v264_v28, %v264_v28 }
 0x235   :  { %490 = vmatmul.mubr.msk.bf16.gmra.mxu1 %vm307_vm3, %v267_v33 }
 0x2e5   :  { %v351_v35 = vpop.f32.mrf.mxu1 }
 0x2e6   :  { %v352_v36 = vadd.f32 %v418_v34, %v351_v35 }
 0x2e7   :  { %v483_v37 = vpop.f32.mrf.mxu1 }
 0x2e8   :  { %v373_v39 = vadd.f32 %v569_v2, %v352_v36 }
 0x2e9   :  { %v354_v40 = vpop.f32.mrf.mxu1 }
 0x2ea   :  { %v431_v41 = vpack.c.bf16 %v373_v39, %v373_v39  ;;  %v355_v42 = vadd.f32 %v418_v34, %v354_v40 }
 0x2eb   :  { %v484_v43 = vpop.f32.mrf.mxu1 }
 0x2ec   :  { %400 = vst.msk [vmem:[%s702_s7] sm:$0xf] %vm399_vm4, %v431_v41  ;;  %v374_v38 = vadd.f32 %v573_v4, %v355_v42 }
 0x2ed   :  { %v359_v44 = vpop.f32.mrf.mxu1 }
 0x2ee   :  { %v432_v45 = vpack.c.bf16 %v374_v38, %v374_v38  ;;  %v360_v46 = vadd.f32 %v418_v34, %v359_v44 }
 0x2ef   :  { %v487_v47 = vpop.f32.mrf.mxu1 }
 0x2f0   :  { %401 = vst.msk [vmem:[%s702_s7 + $0x4] sm:$0xf] %vm399_vm4, %v432_v45  ;;  %v375_v2 = vadd.f32 %v571_v3, %v360_v46 }
 0x2f1   :  { %v362_v48 = vpop.f32.mrf.mxu1 }
 0x2f2   :  { %v433_v49 = vpack.c.bf16 %v375_v2, %v375_v2  ;;  %v363_v50 = vadd.f32 %v418_v34, %v362_v48 }
 0x2f3   :  { %v488_v51 = vpop.f32.mrf.mxu1 }
 0x2f4   :  { %402 = vst.msk [vmem:[%s702_s7 + $0x8] sm:$0xf] %vm399_vm4, %v433_v49  ;;  %v376_v4 = vadd.f32 %v575_v5, %v363_v50 }
 0x2f5   :  { %v367_v52 = vpop.f32.mrf.mxu1 }
 0x2f6   :  { %v434_v53 = vpack.c.bf16 %v376_v4, %v376_v4  ;;  %v368_v54 = vadd.f32 %v418_v34, %v367_v52 }
 0x2f7   :  { %v491_v55 = vpop.f32.mrf.mxu1 }
 0x2f8   :  { %403 = vst.msk [vmem:[%s702_s7 + $0xc] sm:$0xf] %vm399_vm4, %v434_v53  ;;  %v377_v3 = vadd.f32 %v368_v54, %v588_v11 }
 0x2f9   :  { %v370_v56 = vpop.f32.mrf.mxu1 }
 0x2fa   :  { %v435_v57 = vpack.c.bf16 %v377_v3, %v377_v3 }
 0x2fb   :  { %v492_v58 = vpop.f32.mrf.mxu1 }
 0x2fc   :  { %405 = vst.msk [vmem:[%s702_s7 + $0x10] sm:$0x1] %vm404_vm5, %v435_v57 }

// kernel: _lambda_.21
= control target key start
LH: loop header
LB: loop body
LE: loop exit
PB: predicated region body
PF: predicated region fallthrough
CT: control target
= control target key end

     0   :  { %s1325_s12 = smov 0   ;;  %s1327_s13 = smov 0   ;;  %s1460_s0 = inlined_call_operand.vmem [shape: bf16[2,32,4,4], index: 0, kind: input, shape index: {}]   ;;  %s1461_s1 = inlined_call_operand.vmem [shape: f32[4,16], index: 1, kind: input, shape index: {}]   ;;  %s1462_s2 = inlined_call_operand.vmem [shape: f32[16,4], index: 2, kind: input, shape index: {}]   ;;  %s1463_s3 = inlined_call_operand.vmem [shape: f32[2,32,16,16], index: 3, kind: output, shape index: {}]  }
   0x1   :  { %s1329_s14 = smov 0   ;;  %s1331_s15 = smov 0  }
   0x2   :  { %s1333_s16 = smov 0  }
   0x3 LB: > { %s22_s17 = sadd.s32 1, %s1295_s14  ;;  %s25_s18 = sadd.s32 1, %s1299_s15  ;;  %s1303_s16 = sphi %s1333_s16, %s13_s16   ;;  %s1299_s15 = sphi %s1331_s15, %s1467_s15   ;;  %s1295_s14 = sphi %s1329_s14, %s1466_s14   ;;  %s1291_s13 = sphi %s1327_s13, %s1465_s13   ;;  %s1287_s12 = sphi %s1325_s12, %s1464_s12  }
   0x4   : > { %p23_p0 = scmp.ge.s32.totalorder %s22_s17, 4  ;;  %p1095_p1 = scmp.ge.s32.totalorder %s1303_s16, 1 }
   0x5   : > { %p158_p2 = scmp.lt.s32.totalorder %s1303_s16, 9 }
   0x6   : > { %s1469_s17 = smov (%p23_p0, %s22_s17), 0  ;;  %s1471_s18 = smov (!%p23_p0, %s25_s18), %s1299_s15 }
   0x7   : > { %p159_p3 = pnand %p1095_p1, %p158_p2  ;;  %p27_p4 = scmp.ge.s32.totalorder %s1471_s18, 2 }
   0x8   : > { %s1096_s21 = sshll.u32 (!%p159_p3), %s1287_s12, 3  ;;  %p192_p5 = scmp.lt.s32.totalorder (!%p159_p3), %s1291_s13, 1 }
   0x9   : > { %s1473_s18 = smov (%p27_p4, %s1471_s18), 0  ;;  %162 = sbr.rel (%p159_p3) target bundleno = 434 (0x1b2), region = 32 }
   0xa   : > { %p194_p6 = scmp.lt.s32.totalorder (!%p159_p3), %s1096_s21, 31 }
   0xe   : > { %v228_v0 = vld [vmem:[%s1461_s1] sm:$0xf]  ;;  %vm250_vm0 = vcmask 1043456   ;;  %s1475_s13 = smov (!%p192_p5, %s1291_s13), 1  ;;  %s1477_s21 = smov (!%p194_p6, %s1096_s21), 31  ;;  %vm241_vm1 = vcmask 31744  }
   0xf   : > { %1177 = vmatprep.subr.msk.mxu0 %vm250_vm0, %v228_v0  ;;  %s1097_s22 = sshll.u32 %s1475_s13, 5  ;;  %s1101_s23 = sshll.u32 %s1475_s13, 6  ;;  %v347_v21 = vld [vmem:[%s1462_s2] sm:$0xff]  ;;  %v348_v24 = vld [vmem:[%s1462_s2 + $0x8] sm:$0xff]  ;;  %vm432_vm2 = vcmask 130048  }
  0x10   : > { %1178 = vmatpush3.msk.msra.mxu0 %vm250_vm0, %v228_v0  ;;  %s197_s24 = sadd.s32 %s1097_s22, %s1477_s21  ;;  %s1100_s25 = sshll.u32 %s1477_s21, 1  ;;  %1187 = vmatprep.mubr.msk.f32.mxu1 %vm241_vm1, %v347_v21 }
  0x11   : > { %s1098_s26 = sshll.u32 %s197_s24, 1  ;;  %s1360_s27 = sadd.s32 %s1101_s23, %s1100_s25 }
  0x12   : > { %s199_s30 = scalar_lea.vmem %s1460_s0, %s1098_s26  ;;  %s1102_s8 = sshll.u32 %s1360_s27, 3 }
  0x13   : > { %v212_v1 = vld [vmem:[%s199_s30] sm:$0x3]  ;;  %v213_v2 = vld [vmem:[%s199_s30 + $0x2] sm:$0x3]  ;;  %v214_v3 = vld [vmem:[%s199_s30 + $0x4] sm:$0x3]  ;;  %s1411_s11 = scalar_lea.vmem %s1463_s3, %s1102_s8 }
  0x14   : > { %v220_v4 = vunpack.c.l.bf16 %v212_v1  ;;  %v221_v5 = vunpack.c.l.bf16 %v213_v2  ;;  %v215_v6 = vld [vmem:[%s199_s30 + $0x6] sm:$0x3]  ;;  %v222_v7 = vunpack.c.l.bf16 %v214_v3  ;;  %v216_v8 = vld [vmem:[%s199_s30 + $0x8] sm:$0x3]  ;;  %v217_v9 = vld [vmem:[%s199_s30 + $0xa] sm:$0x3] }
  0x15   : > { %v223_v10 = vunpack.c.l.bf16 %v215_v6  ;;  %v224_v11 = vunpack.c.l.bf16 %v216_v8  ;;  %v225_v12 = vunpack.c.l.bf16 %v217_v9  ;;  %v218_v13 = vld [vmem:[%s199_s30 + $0xc] sm:$0x3]  ;;  %v219_v14 = vld [vmem:[%s199_s30 + $0xe] sm:$0x3] }
  0x16   : > { %v237_v15 = vcombine.low %v220_v4, %v221_v5  ;;  %v226_v16 = vunpack.c.l.bf16 %v218_v13  ;;  %v227_v17 = vunpack.c.l.bf16 %v219_v14 }
  0x17   : > { %v238_v18 = vcombine.low %v222_v7, %v223_v10  ;;  %v239_v19 = vcombine.low %v224_v11, %v225_v12 }
  0x18   : > { %1179 = vmatprep.mubr.msk.f32.mxu0 %vm241_vm1, %v237_v15  ;;  %v240_v20 = vcombine.low %v226_v16, %v227_v17 }
  0x19   : > { %1180 = vmatmul.mubr.msk.f32.vlgmr.msra.gmra.mxu0 %vm241_vm1, %v238_v18 }
  0x1a   : > { %1182 = vmatprep.mubr.msk.f32.mxu0 %vm241_vm1, %v239_v19 }
  0x1d   : > { %1183 = vmatmul.mubr.msk.f32.gmra.mxu0 %vm241_vm1, %v240_v20 }
  0x1e   : > { %1197 = vmatprep.mubr.msk.f32.mxu0 %vm241_vm1, %v347_v21 }
  0xd9   : > { %v1181_v22 = vpop.f32.mrf.mxu0 }
  0xda   : > { %1195 = vmatprep.subr.msk.mxu0 %vm250_vm0, %v1181_v22  ;;  %v344_v27 = vcombine.high %v1181_v22, %v1181_v22 }
  0xdb   : > { %v320_v23 = vpop.f32.mrf.mxu0  ;;  %1196 = vmatpush3.msk.msra.mxu0 %vm250_vm0, %v1181_v22 }
  0xdc   : > { %v343_v25 = vcombine.high %v320_v23, %v320_v23  ;;  %1185 = vmatprep.subr.msk.mxu1 %vm250_vm0, %v320_v23  ;;  %1198 = vmatmul.mubr.msk.f32.vlgmr.msra.gmra.mxu0 %vm241_vm1, %v348_v24 }
  0xdd   : > { %v1184_v26 = vpop.f32.mrf.mxu0  ;;  %1186 = vmatpush3.msk.msra.mxu1 %vm250_vm0, %v320_v23  ;;  %1207 = vmatprep.mubr.msk.f32.mxu0 %vm241_vm1, %v347_v21 }
  0xde   : > { %1188 = vmatmul.mubr.msk.f32.vlgmr.msra.gmra.mxu1 %vm241_vm1, %v348_v24  ;;  %1190 = vmatprep.subr.msk.mxu1 %vm250_vm0, %v343_v25  ;;  %v346_v30 = vcombine.high %v1184_v26, %v1184_v26 }
  0xdf   : > { %v330_v28 = vpop.f32.mrf.mxu0  ;;  %1191 = vmatpush3.msk.msra.mxu1 %vm250_vm0, %v343_v25  ;;  %1192 = vmatprep.mubr.msk.f32.mxu1 %vm241_vm1, %v347_v21 }
  0xe0   : > { %v345_v29 = vcombine.high %v330_v28, %v330_v28  ;;  %1200 = vmatprep.subr.msk.mxu1 %vm250_vm0, %v344_v27  ;;  %1205 = vmatprep.subr.msk.mxu0 %vm250_vm0, %v330_v28 }
  0xe1   : > { %1206 = vmatpush3.msk.msra.mxu0 %vm250_vm0, %v330_v28 }
  0xe2   : > { %1193 = vmatmul.mubr.msk.f32.vlgmr.msra.gmra.mxu1 %vm241_vm1, %v348_v24  ;;  %1215 = vmatprep.subr.msk.mxu0 %vm250_vm0, %v1184_v26 }
  0xe3   : > { %1201 = vmatpush3.msk.msra.mxu1 %vm250_vm0, %v344_v27  ;;  %1208 = vmatmul.mubr.msk.f32.vlgmr.msra.gmra.mxu0 %vm241_vm1, %v348_v24 }
  0xe4   : > { %1216 = vmatpush3.msk.msra.mxu0 %vm250_vm0, %v1184_v26  ;;  %1210 = vmatprep.subr.msk.mxu1 %vm250_vm0, %v345_v29 }
  0xe5   : > { %1202 = vmatprep.mubr.msk.f32.mxu1 %vm241_vm1, %v347_v21  ;;  %1217 = vmatprep.mubr.msk.f32.mxu0 %vm241_vm1, %v347_v21 }
  0xe6   : > { %1203 = vmatmul.mubr.msk.f32.vlgmr.msra.gmra.mxu1 %vm241_vm1, %v348_v24 }
  0xe7   : > { %1211 = vmatpush3.msk.msra.mxu1 %vm250_vm0, %v345_v29  ;;  %1212 = vmatprep.mubr.msk.f32.mxu1 %vm241_vm1, %v347_v21 }
  0xe8   : > { %1220 = vmatprep.subr.msk.mxu1 %vm250_vm0, %v346_v30  ;;  %1218 = vmatmul.mubr.msk.f32.vlgmr.msra.gmra.mxu0 %vm241_vm1, %v348_v24 }
  0xea   : > { %1213 = vmatmul.mubr.msk.f32.vlgmr.msra.gmra.mxu1 %vm241_vm1, %v348_v24 }
  0xeb   : > { %1221 = vmatpush3.msk.msra.mxu1 %vm250_vm0, %v346_v30  ;;  %1222 = vmatprep.mubr.msk.f32.mxu1 %vm241_vm1, %v347_v21 }
  0xee   : > { %1223 = vmatmul.mubr.msk.f32.vlgmr.msra.gmra.mxu1 %vm241_vm1, %v348_v24 }
 0x19c   : > { %v1199_v31 = vpop.f32.mrf.mxu0 }
 0x19d   : > { %1120 = vst.msk [vmem:[%s1411_s11 + $0x28] sm:$0xff] %vm432_vm2, %v1199_v31 }
 0x19e   : > { %v1189_v32 = vpop.f32.mrf.mxu1  ;;  %v583_v33 = vpop.f32.mrf.mxu0 }
 0x19f   : > { %434 = vst.msk [vmem:[%s1411_s11 + $0x8] sm:$0xff] %vm432_vm2, %v1189_v32  ;;  %1119 = vst.msk [vmem:[%s1411_s11 + $0x20] sm:$0xff] %vm432_vm2, %v583_v33 }
 0x1a0   : > { %v423_v34 = vpop.f32.mrf.mxu1 }
 0x1a1   : > { %433 = vst.msk [vmem:[%s1411_s11] sm:$0xff] %vm432_vm2, %v423_v34 }
 0x1a2   : > { %v1194_v35 = vpop.f32.mrf.mxu1 }
 0x1a3   : > { %1115 = vst.msk [vmem:[%s1411_s11 + $0x18] sm:$0xff] %vm432_vm2, %v1194_v35  ;;  %v1209_v36 = vpop.f32.mrf.mxu0 }
 0x1a4   : > { %v503_v37 = vpop.f32.mrf.mxu1  ;;  %1130 = vst.msk [vmem:[%s1411_s11 + $0x48] sm:$0xff] %vm432_vm2, %v1209_v36 }
 0x1a5   : > { %1114 = vst.msk [vmem:[%s1411_s11 + $0x10] sm:$0xff] %vm432_vm2, %v503_v37  ;;  %v743_v38 = vpop.f32.mrf.mxu0 }
 0x1a6   : > { %v1204_v39 = vpop.f32.mrf.mxu1  ;;  %1129 = vst.msk [vmem:[%s1411_s11 + $0x40] sm:$0xff] %vm432_vm2, %v743_v38 }
 0x1a7   : > { %1125 = vst.msk [vmem:[%s1411_s11 + $0x38] sm:$0xff] %vm432_vm2, %v1204_v39 }
 0x1a8   : > { %v663_v40 = vpop.f32.mrf.mxu1  ;;  %v1219_v41 = vpop.f32.mrf.mxu0 }
 0x1a9   : > { %1124 = vst.msk [vmem:[%s1411_s11 + $0x30] sm:$0xff] %vm432_vm2, %v663_v40  ;;  %1140 = vst.msk [vmem:[%s1411_s11 + $0x68] sm:$0xff] %vm432_vm2, %v1219_v41 }
 0x1aa   : > { %v1214_v42 = vpop.f32.mrf.mxu1  ;;  %v903_v43 = vpop.f32.mrf.mxu0 }
 0x1ab   : > { %1135 = vst.msk [vmem:[%s1411_s11 + $0x58] sm:$0xff] %vm432_vm2, %v1214_v42  ;;  %1139 = vst.msk [vmem:[%s1411_s11 + $0x60] sm:$0xff] %vm432_vm2, %v903_v43 }
 0x1ac   : > { %v823_v44 = vpop.f32.mrf.mxu1 }
 0x1ad   : > { %1134 = vst.msk [vmem:[%s1411_s11 + $0x50] sm:$0xff] %vm432_vm2, %v823_v44 }
 0x1ae   : > { %v1224_v45 = vpop.f32.mrf.mxu1 }
 0x1af   : > { %1145 = vst.msk [vmem:[%s1411_s11 + $0x78] sm:$0xff] %vm432_vm2, %v1224_v45 }
 0x1b0   : > { %v983_v46 = vpop.f32.mrf.mxu1 }
 0x1b1   : > { %1144 = vst.msk [vmem:[%s1411_s11 + $0x70] sm:$0xff] %vm432_vm2, %v983_v46 }
 0x1b2 PF: > { %s13_s16 = sadd.s32 1, %s1303_s16   ;;  %s1464_s12 = smov %s1295_s14 }
 0x1b3   : > { %p10_p7 = scmp.ge.s32.totalorder %s13_s16, 10   ;;  %s1465_s13 = smov %s1299_s15 }
 0x1b4   : > { %s1466_s14 = smov %s1469_s17  ;;  %s1467_s15 = smov %s1473_s18 }
 0x1b5   :  { %12 = sbr.rel (!%p10_p7) target bundleno = 3 (0x3), region = 69 }

</bundles_post_ra>
